<compile_context>
chip_gen: v7x
topology: tpu7x:2x2x1
jax: 0.10.0
libtpu: 0.0.40
codegen_flags: <defaults>
</compile_context>

<pallas_src>
import jax
import jax.numpy as jnp
from jax.experimental import pallas as pl
from jax.experimental.pallas import tpu as pltpu

BN_EPS = 1e-5        # torch.nn.BatchNorm1d default eps
NORM_EPS = 1e-12     # torch.nn.functional.normalize default eps


def _bn_relu_fc2_norm(h, w2, b2, gamma, beta):
    """Shared tail: BatchNorm1d (train mode) -> ReLU -> Linear -> L2-normalize."""
    mean = jnp.mean(h, axis=0, keepdims=True)                       # (1, H)
    var = jnp.mean((h - mean) * (h - mean), axis=0, keepdims=True)  # biased var
    scale = gamma * jax.lax.rsqrt(var + BN_EPS)                     # folded affine
    shift = beta - mean * scale
    h = jnp.maximum(h * scale + shift, 0.0)                         # BN + ReLU
    out = jnp.dot(h.astype(jnp.bfloat16), w2,
                  preferred_element_type=jnp.float32) + b2          # Linear(512->128)
    out_sq = jnp.sum(out * out, axis=-1, keepdims=True)
    return out * jax.lax.rsqrt(jnp.maximum(out_sq, NORM_EPS * NORM_EPS))


def _head_kernel_single(feat_ref, w1_ref, w2_ref, b2_ref, gamma_ref, beta_ref,
                        featn_ref, outn_ref):
    """grid=() path for small batches: everything resident, one shot."""
    feat = feat_ref[...]                                 # f32 copy for normalize
    h = jnp.dot(feat.astype(jnp.bfloat16), w1_ref[...],
                preferred_element_type=jnp.float32)      # Linear(2048->512), no bias
    outn_ref[...] = _bn_relu_fc2_norm(h, w2_ref[...], b2_ref[...],
                                      gamma_ref[...], beta_ref[...])
    feat_sq = jnp.sum(feat * feat, axis=-1, keepdims=True)
    featn_ref[...] = feat * jax.lax.rsqrt(
        jnp.maximum(feat_sq, NORM_EPS * NORM_EPS))


def _head_kernel_ktiled(feat_ref, sq_ref, w1_ref, w2_ref, b2_ref, gamma_ref,
                        beta_ref, featn_ref, outn_ref, h_acc):
    """K-tiled path for SimCLR-scale batches.

    Per step: accumulate a (B, 512) f32 partial of feat @ w1 and emit the
    corresponding lane-dense normalized-feature block.  The BN / ReLU / second
    matmul / output normalization run once under pl.when on the last K step.
    """
    k = pl.program_id(0)

    @pl.when(k == 0)
    def _init():
        h_acc[...] = jnp.zeros_like(h_acc)

    feat = feat_ref[...]                                  # (B, tk) f32
    h_acc[...] += jnp.dot(feat.astype(jnp.bfloat16), w1_ref[...],
                          preferred_element_type=jnp.float32)

    # Normalized-feature block: row sum-of-squares is supplied as a tiny input
    # so each K block can be written (and pipelined) immediately.
    inv = jax.lax.rsqrt(jnp.maximum(sq_ref[...], NORM_EPS * NORM_EPS))
    featn_ref[...] = feat * inv

    @pl.when(k == pl.num_programs(0) - 1)
    def _finish():
        outn_ref[...] = _bn_relu_fc2_norm(h_acc[...], w2_ref[...], b2_ref[...],
                                          gamma_ref[...], beta_ref[...])


def prepare_head_params(w1, w2, b2, gamma, beta):
    """One-time parameter prep.

    The f32->bf16 weight casts live HERE (outside the step / jit of the
    training loop) so they are not re-emitted and re-streamed through HBM on
    every call — that per-call convert previously doubled the dominant w1
    stream (8 MiB vs 4 MiB)."""
    C, H = w1.shape
    D = w2.shape[1]
    assert w2.shape[0] == H
    return dict(
        w1=jnp.asarray(w1, jnp.bfloat16),                 # (2048, 512) bf16
        w2=jnp.asarray(w2, jnp.bfloat16),                 # (512, 128)  bf16
        b2=jnp.asarray(b2, jnp.float32).reshape(1, D),
        gamma=jnp.asarray(gamma, jnp.float32).reshape(1, H),
        beta=jnp.asarray(beta, jnp.float32).reshape(1, H),
    )


def projection_head(x_nchw, params, *, k_tile=None):
    """x_nchw: (B, 2048, 1, 1) pooled backbone output (NCHW).

    Returns (F.normalize(feature, dim=-1), F.normalize(g(feature), dim=-1))."""
    B = x_nchw.shape[0]
    if B < 2:
        # PyTorch BatchNorm1d raises in train mode with a single sample.
        raise ValueError("BatchNorm1d (train mode) requires batch size >= 2")

    feat = x_nchw.reshape(B, -1).astype(jnp.float32)      # torch.flatten(x, 1)
    C = feat.shape[1]
    w1, w2 = params["w1"], params["w2"]
    H, D = w2.shape
    assert w1.shape == (C, H)
    b2, gamma, beta = params["b2"], params["gamma"], params["beta"]

    if k_tile is None and B >= 256:
        k_tile = 512   # SimCLR-scale: pipeline w1 / feat / featn against the MXU

    if k_tile is None:
        # ---------------- single-shot path (small B) ----------------
        full = lambda shape: pl.BlockSpec(shape, lambda: (0,) * len(shape))
        est = int(1.3 * (8 * B * C + 2 * C * H + 2 * H * D
                         + 4 * B * D + 16 * H + 4 * D))
        vmem_bytes = min(max(8 << 20, est), 48 << 20)
        return pl.pallas_call(
            _head_kernel_single,
            out_shape=(
                jax.ShapeDtypeStruct((B, C), jnp.float32),
                jax.ShapeDtypeStruct((B, D), jnp.float32),
            ),
            grid_spec=pltpu.PrefetchScalarGridSpec(
                num_scalar_prefetch=0,
                grid=(),
                in_specs=[
                    full((B, C)),    # feat (f32)
                    full((C, H)),    # w1 (bf16, cast hoisted to prepare_head_params)
                    full((H, D)),    # w2 (bf16)
                    full((1, D)),    # b2
                    full((1, H)),    # gamma
                    full((1, H)),    # beta
                ],
                out_specs=[full((B, C)), full((B, D))],
            ),
            compiler_params=pltpu.CompilerParams(vmem_limit_bytes=vmem_bytes),
        )(feat, w1, w2, b2, gamma, beta)

    # ---------------- K-tiled path (large B) ----------------
    assert C % k_tile == 0 and k_tile % 128 == 0
    nk = C // k_tile
    # Row sum-of-squares for F.normalize(feature): computed once here so the
    # kernel can emit lane-dense featn blocks at every K step (fully static
    # BlockSpecs, no dynamic lane-dim stores).
    sq = jnp.sum(feat * feat, axis=-1, keepdims=True)     # (B, 1) f32

    fullk = lambda shape: pl.BlockSpec(shape, lambda k: (0,) * len(shape))
    est = int(1.5 * (2 * (8 * B * k_tile + 2 * k_tile * H)   # dbl-buffered blocks
                     + 4 * B * (H + D + 128)                 # h_acc, outn, sq(pad)
                     + 2 * H * D + 16 * H + 4 * D))
    vmem_bytes = min(max(8 << 20, est), 48 << 20)

    return pl.pallas_call(
        _head_kernel_ktiled,
        out_shape=(
            jax.ShapeDtypeStruct((B, C), jnp.float32),
            jax.ShapeDtypeStruct((B, D), jnp.float32),
        ),
        grid_spec=pltpu.PrefetchScalarGridSpec(
            num_scalar_prefetch=0,
            grid=(nk,),
            in_specs=[
                pl.BlockSpec((B, k_tile), lambda k: (0, k)),   # feat K-block
                fullk((B, 1)),                                 # row sum-of-squares
                pl.BlockSpec((k_tile, H), lambda k: (k, 0)),   # w1 K-block (bf16)
                fullk((H, D)),                                 # w2 (bf16)
                fullk((1, D)),                                 # b2
                fullk((1, H)),                                 # gamma
                fullk((1, H)),                                 # beta
            ],
            out_specs=[
                pl.BlockSpec((B, k_tile), lambda k: (0, k)),   # featn K-block
                fullk((B, D)),                                 # outn (resident)
            ],
            scratch_shapes=[pltpu.VMEM((B, H), jnp.float32)],  # f32 h accumulator
        ),
        compiler_params=pltpu.CompilerParams(
            dimension_semantics=("arbitrary",),
            vmem_limit_bytes=vmem_bytes,
        ),
    )(feat, sq, w1, w2, b2, gamma, beta)


def _reference(feat, w1, w2, b2, gamma, beta):
    """Pure-JAX f32 reference of the projection head (train-mode BN)."""
    h = feat @ w1
    mean = h.mean(axis=0, keepdims=True)
    var = ((h - mean) ** 2).mean(axis=0, keepdims=True)
    h = (h - mean) / jnp.sqrt(var + BN_EPS) * gamma[None, :] + beta[None, :]
    h = jnp.maximum(h, 0.0)
    out = h @ w2 + b2[None, :]
    fn = feat / jnp.maximum(
        jnp.linalg.norm(feat, axis=-1, keepdims=True), NORM_EPS)
    on = out / jnp.maximum(
        jnp.linalg.norm(out, axis=-1, keepdims=True), NORM_EPS)
    return fn, on


if __name__ == "__main__":
    key = jax.random.PRNGKey(0)
    k_x, k_w1, k_w2, k_b2, k_g, k_b = jax.random.split(key, 6)

    B, C, H, D = 8, 2048, 512, 128   # C/H/D are fixed by the module definition

    # Backbone output feature map (post global-avg-pool), NCHW (B, 2048, 1, 1).
    x = jax.random.normal(k_x, (B, C, 1, 1), dtype=jnp.float32)

    # Deterministic parameter init (kaiming-uniform-like scaling).
    w1 = jax.random.uniform(k_w1, (C, H), jnp.float32, -1.0, 1.0) * (C ** -0.5)
    w2 = jax.random.uniform(k_w2, (H, D), jnp.float32, -1.0, 1.0) * (H ** -0.5)
    b2 = jax.random.uniform(k_b2, (D,), jnp.float32, -1.0, 1.0) * (H ** -0.5)
    # BN affine params (PyTorch default init is gamma=1, beta=0; use nontrivial
    # values here to exercise the affine path).
    gamma = 1.0 + 0.1 * jax.random.normal(k_g, (H,), dtype=jnp.float32)
    beta = 0.1 * jax.random.normal(k_b, (H,), dtype=jnp.float32)

    # Weight dtype casts happen exactly once, outside the per-step call.
    params = prepare_head_params(w1, w2, b2, gamma, beta)

    ref_fn, ref_on = _reference(x.reshape(B, -1), w1, w2, b2, gamma, beta)

    # Small-batch single-shot path (selected automatically at B < 256).
    fn_s, on_s = projection_head(x, params)
    # K-tiled path (selected automatically at B >= 256); forced here so both
    # code paths are compiled and validated.
    fn_t, on_t = projection_head(x, params, k_tile=512)
    jax.block_until_ready((fn_s, on_s, fn_t, on_t))

    for fn, on in ((fn_s, on_s), (fn_t, on_t)):
        assert fn.shape == (B, C) and on.shape == (B, D)
        # L2-normalized rows should have unit norm.
        assert jnp.allclose(jnp.linalg.norm(fn, axis=-1), 1.0, atol=1e-4)
        assert jnp.allclose(jnp.linalg.norm(on, axis=-1), 1.0, atol=1e-4)
        # Feature branch stays f32 -> tight; g() uses bf16 weights -> loose.
        assert jnp.max(jnp.abs(fn - ref_fn)) < 1e-4
        assert jnp.max(jnp.abs(on - ref_on)) < 3e-2

    print("KERNEL_OK")
</pallas_src>

<mosaic_0001>
module attributes {stable_mosaic.version = 11 : i64} {
  func.func @_head_kernel_single(%arg0: memref<8x2048xf32, #tpu.memory_space<vmem>>, %arg1: memref<2048x512xbf16, #tpu.memory_space<vmem>>, %arg2: memref<512x128xbf16, #tpu.memory_space<vmem>>, %arg3: memref<1x128xf32, #tpu.memory_space<vmem>>, %arg4: memref<1x512xf32, #tpu.memory_space<vmem>>, %arg5: memref<1x512xf32, #tpu.memory_space<vmem>>, %arg6: memref<8x2048xf32, #tpu.memory_space<vmem>>, %arg7: memref<8x128xf32, #tpu.memory_space<vmem>>) attributes {dimension_semantics = [], scalar_prefetch = 0 : i64, scratch_operands = 0 : i64, tpu.core_type = #tpu.core_type<tc>} {
    %c0 = arith.constant 0 : index
    %c0_0 = arith.constant 0 : index
    %0 = vector.load %arg0[%c0, %c0_0] : memref<8x2048xf32, #tpu.memory_space<vmem>>, vector<8x2048xf32>
    %1 = arith.truncf %0 : vector<8x2048xf32> to vector<8x2048xbf16>
    %c0_1 = arith.constant 0 : index
    %c0_2 = arith.constant 0 : index
    %2 = vector.load %arg1[%c0_1, %c0_2] : memref<2048x512xbf16, #tpu.memory_space<vmem>>, vector<2048x512xbf16>
    %cst = arith.constant dense<0.000000e+00> : vector<8x512xf32>
    %3 = tpu.matmul %1, %2, %cst {dimension_numbers = #tpu.dot_dimension_numbers<[1], [0], [0], [1], [0, 0, 1, 1], [], []>} : vector<8x2048xbf16>, vector<2048x512xbf16>, vector<8x512xf32> -> vector<8x512xf32>
    %c0_3 = arith.constant 0 : index
    %c0_4 = arith.constant 0 : index
    %4 = vector.load %arg2[%c0_3, %c0_4] : memref<512x128xbf16, #tpu.memory_space<vmem>>, vector<512x128xbf16>
    %c0_5 = arith.constant 0 : index
    %c0_6 = arith.constant 0 : index
    %5 = vector.load %arg3[%c0_5, %c0_6] : memref<1x128xf32, #tpu.memory_space<vmem>>, vector<1x128xf32>
    %c0_7 = arith.constant 0 : index
    %c0_8 = arith.constant 0 : index
    %6 = vector.load %arg4[%c0_7, %c0_8] : memref<1x512xf32, #tpu.memory_space<vmem>>, vector<1x512xf32>
    %c0_9 = arith.constant 0 : index
    %c0_10 = arith.constant 0 : index
    %7 = vector.load %arg5[%c0_9, %c0_10] : memref<1x512xf32, #tpu.memory_space<vmem>>, vector<1x512xf32>
    %cst_11 = arith.constant dense<0.000000e+00> : vector<512xf32>
    %8 = vector.multi_reduction <add>, %3, %cst_11 [0] : vector<8x512xf32> to vector<512xf32>
    %9 = vector.shape_cast %8 : vector<512xf32> to vector<1x512xf32>
    %cst_12 = arith.constant 8.000000e+00 : f32
    %10 = vector.broadcast %cst_12 : f32 to vector<1x512xf32>
    %11 = arith.divf %9, %10 : vector<1x512xf32>
    %12 = vector.broadcast %11 : vector<1x512xf32> to vector<8x512xf32>
    %13 = arith.subf %3, %12 : vector<8x512xf32>
    %14 = vector.broadcast %11 : vector<1x512xf32> to vector<8x512xf32>
    %15 = arith.subf %3, %14 : vector<8x512xf32>
    %16 = arith.mulf %13, %15 : vector<8x512xf32>
    %cst_13 = arith.constant dense<0.000000e+00> : vector<512xf32>
    %17 = vector.multi_reduction <add>, %16, %cst_13 [0] : vector<8x512xf32> to vector<512xf32>
    %18 = vector.shape_cast %17 : vector<512xf32> to vector<1x512xf32>
    %cst_14 = arith.constant 8.000000e+00 : f32
    %19 = vector.broadcast %cst_14 : f32 to vector<1x512xf32>
    %20 = arith.divf %18, %19 : vector<1x512xf32>
    %cst_15 = arith.constant 9.99999974E-6 : f32
    %21 = vector.broadcast %cst_15 : f32 to vector<1x512xf32>
    %22 = arith.addf %20, %21 : vector<1x512xf32>
    %23 = math.rsqrt %22 : vector<1x512xf32>
    %24 = arith.mulf %6, %23 : vector<1x512xf32>
    %25 = arith.mulf %11, %24 : vector<1x512xf32>
    %26 = arith.subf %7, %25 : vector<1x512xf32>
    %27 = vector.broadcast %24 : vector<1x512xf32> to vector<8x512xf32>
    %28 = arith.mulf %3, %27 : vector<8x512xf32>
    %29 = vector.broadcast %26 : vector<1x512xf32> to vector<8x512xf32>
    %30 = arith.addf %28, %29 : vector<8x512xf32>
    %cst_16 = arith.constant 0.000000e+00 : f32
    %31 = vector.broadcast %cst_16 : f32 to vector<8x512xf32>
    %32 = arith.maximumf %30, %31 : vector<8x512xf32>
    %33 = arith.truncf %32 : vector<8x512xf32> to vector<8x512xbf16>
    %cst_17 = arith.constant dense<0.000000e+00> : vector<8x128xf32>
    %34 = tpu.matmul %33, %4, %cst_17 {dimension_numbers = #tpu.dot_dimension_numbers<[1], [0], [0], [1], [0, 0, 1, 1], [], []>} : vector<8x512xbf16>, vector<512x128xbf16>, vector<8x128xf32> -> vector<8x128xf32>
    %35 = vector.broadcast %5 : vector<1x128xf32> to vector<8x128xf32>
    %36 = arith.addf %34, %35 : vector<8x128xf32>
    %37 = arith.mulf %36, %36 : vector<8x128xf32>
    %cst_18 = arith.constant dense<0.000000e+00> : vector<8xf32>
    %38 = vector.multi_reduction <add>, %37, %cst_18 [1] : vector<8x128xf32> to vector<8xf32>
    %39 = vector.shape_cast %38 : vector<8xf32> to vector<8x1xf32>
    %cst_19 = arith.constant 1.000000e-24 : f32
    %40 = vector.broadcast %cst_19 : f32 to vector<8x1xf32>
    %41 = arith.maximumf %39, %40 : vector<8x1xf32>
    %42 = math.rsqrt %41 : vector<8x1xf32>
    %43 = vector.broadcast %42 : vector<8x1xf32> to vector<8x128xf32>
    %44 = arith.mulf %36, %43 : vector<8x128xf32>
    %c0_20 = arith.constant 0 : index
    %c0_21 = arith.constant 0 : index
    %45 = vector.load %arg7[%c0_20, %c0_21] : memref<8x128xf32, #tpu.memory_space<vmem>>, vector<8x128xf32>
    tpu.vector_store %arg7[%c0_20, %c0_21], %44 {strides = array<i32>} : memref<8x128xf32, #tpu.memory_space<vmem>>, vector<8x128xf32>,
    %46 = arith.mulf %0, %0 : vector<8x2048xf32>
    %cst_22 = arith.constant dense<0.000000e+00> : vector<8xf32>
    %47 = vector.multi_reduction <add>, %46, %cst_22 [1] : vector<8x2048xf32> to vector<8xf32>
    %48 = vector.shape_cast %47 : vector<8xf32> to vector<8x1xf32>
    %cst_23 = arith.constant 1.000000e-24 : f32
    %49 = vector.broadcast %cst_23 : f32 to vector<8x1xf32>
    %50 = arith.maximumf %48, %49 : vector<8x1xf32>
    %51 = math.rsqrt %50 : vector<8x1xf32>
    %52 = vector.broadcast %51 : vector<8x1xf32> to vector<8x2048xf32>
    %53 = arith.mulf %0, %52 : vector<8x2048xf32>
    %c0_24 = arith.constant 0 : index
    %c0_25 = arith.constant 0 : index
    %54 = vector.load %arg6[%c0_24, %c0_25] : memref<8x2048xf32, #tpu.memory_space<vmem>>, vector<8x2048xf32>
    tpu.vector_store %arg6[%c0_24, %c0_25], %53 {strides = array<i32>} : memref<8x2048xf32, #tpu.memory_space<vmem>>, vector<8x2048xf32>,
    return
  }
}

</mosaic_0001>

<bundles_post_ra>
// kernel: tpu_custom_call.1
= control target key start
LH: loop header
LB: loop body
LE: loop exit
PB: predicated region body
PF: predicated region fallthrough
CT: control target
= control target key end

     0   :  { %13 = vsyncpa [#allocation3], 0  ;;  %s6456_s0 = inlined_call_operand.hbm [shape: f32[8,2048], index: 0, kind: input, shape index: {}]   ;;  %s6457_s1 = inlined_call_operand.hbm [shape: bf16[2048,512], index: 1, kind: input, shape index: {}]   ;;  %s6458_s2 = inlined_call_operand.hbm [shape: bf16[512,128], index: 2, kind: input, shape index: {}]   ;;  %s6459_s3 = inlined_call_operand.hbm [shape: f32[1,128], index: 3, kind: input, shape index: {}]   ;;  %s6460_s4 = inlined_call_operand.hbm [shape: f32[1,512], index: 4, kind: input, shape index: {}]   ;;  %s6461_s5 = inlined_call_operand.hbm [shape: f32[1,512], index: 5, kind: input, shape index: {}]   ;;  %s6462_s6 = inlined_call_operand.hbm [shape: f32[8,2048], index: 6, kind: output, shape index: {0}]   ;;  %s6463_s7 = inlined_call_operand.hbm [shape: f32[8,128], index: 7, kind: output, shape index: {1}]  }
   0x1   :  { %14 = vsyncpa [#allocation6], 0 }
   0x2   :  { %15 = vsyncpa [#allocation9], 0 }
   0x3   :  { %16 = vsyncpa [#allocation12], 0 }
   0x4   :  { %17 = vsyncpa [#allocation4], 0 }
   0x5   :  { %18 = vsyncpa [#allocation15], 0  ;;  %s6179_s24 = smov [#allocation5]   ;;  %s5991_s28 = scalar_lea.hbm %s6457_s1, 65536 }
   0x6   :  { %s34_s25 = sshll.u32 %s6179_s24, 4  ;;  %p5992_p0 = scmp.ne.s32.totalorder %s6457_s1, %s5991_s28  ;;  %s35_s25 = int_to_ptr.vmem [resolvable:$true] %s34_s25 }
   0x7   :  { %p5995_p1 = scmp.lt.u32.totalorder %s5991_s28, %s6457_s1 }
   0x9   :  { %p5997_p2 = pnand %p5995_p1, %p5992_p0 }
   0xb   :  { %6000 = shalt.err (!%p5997_p2)
}
   0xc   :  { %s6001_s10 = scalar_lea.vmem %s35_s25, 65536  ;;  %p6006_p4 = scmp.lt.s32.totalorder %s35_s25, %s35_s25 }
   0xd   :  { %p6002_p3 = scmp.ne.s32.totalorder %s35_s25, %s6001_s10  ;;  %p6007_p5 = scmp.lt.s32.totalorder %s6001_s10, %s6001_s10 }
   0xf   :  { %p6008_p6 = por %p6007_p5, %p6006_p4 }
  0x11   :  { %p6009_p7 = pnand %p6008_p6, %p6002_p3 }
  0x13   :  { %6012 = shalt.err (!%p6009_p7)
}
  0x14   :  { %s6180_s11 = smov 256   ;;  %s6181_s12 = smov 16  }
  0x15   :  { %40 = dma.hbm_to_vmem [thread:$0]  %s6457_s1, 65536, %s35_s25, [#allocation6], %s6180_s11, %s6180_s11, %s6181_s12  }
  0x16   :  { %s6182_s15 = smov [#allocation8]   ;;  %s6183_s17 = smov [#allocation2]  }
  0x17   :  { %s59_s16 = sshll.u32 %s6182_s15, 4  ;;  %s25_s18 = sshll.u32 %s6183_s17, 4  ;;  %s60_s16 = int_to_ptr.vmem [resolvable:$true] %s59_s16  ;;  %s26_s18 = int_to_ptr.vmem [resolvable:$true] %s25_s18 }
  0x18   :  { %s6013_s21 = scalar_lea.hbm %s6459_s3, 16 }
  0x19   :  { %p6014_p8 = scmp.ne.s32.totalorder %s6459_s3, %s6013_s21  ;;  %p6017_p9 = scmp.lt.u32.totalorder %s6013_s21, %s6459_s3 }
  0x1b   :  { %p6019_p10 = pnand %p6017_p9, %p6014_p8 }
  0x1d   :  { %6022 = shalt.err (!%p6019_p10)
}
  0x1e   :  { %s6023_s1 = scalar_lea.vmem %s60_s16, 16  ;;  %s6027_s25 = scalar_lea.vmem %s60_s16, 32 }
  0x1f   :  { %p6024_p11 = scmp.ne.s32.totalorder %s60_s16, %s6023_s1  ;;  %p6028_p12 = scmp.lt.s32.totalorder %s60_s16, %s60_s16 }
  0x20   :  { %p6029_p13 = scmp.lt.s32.totalorder %s6027_s25, %s6023_s1 }
  0x22   :  { %p6030_p0 = por %p6029_p13, %p6028_p12 }
  0x24   :  { %p6031_p1 = pnand %p6030_p0, %p6024_p11 }
  0x26   :  { %6034 = shalt.err (!%p6031_p1)
}
  0x27   :  { %62 = dma.hbm_to_vmem [thread:$0]  %s6459_s3, 16, %s60_s16, [#allocation9]  }
  0x28   :  { %s6035_s8 = scalar_lea.hbm %s6456_s0, 2048 }
  0x29   :  { %p6036_p2 = scmp.ne.s32.totalorder %s6456_s0, %s6035_s8  ;;  %p6039_p3 = scmp.lt.u32.totalorder %s6035_s8, %s6456_s0 }
  0x2b   :  { %p6041_p4 = pnand %p6039_p3, %p6036_p2 }
  0x2d   :  { %6044 = shalt.err (!%p6041_p4)
}
  0x2e   :  { %s6045_s13 = scalar_lea.vmem %s26_s18, 2048  ;;  %p6050_p6 = scmp.lt.s32.totalorder %s26_s18, %s26_s18 }
  0x2f   :  { %p6046_p5 = scmp.ne.s32.totalorder %s26_s18, %s6045_s13  ;;  %p6051_p7 = scmp.lt.s32.totalorder %s6045_s13, %s6045_s13 }
  0x31   :  { %p6052_p8 = por %p6051_p7, %p6050_p6 }
  0x33   :  { %p6053_p9 = pnand %p6052_p8, %p6046_p5 }
  0x35   :  { %6056 = shalt.err (!%p6053_p9)
}
  0x36   :  { %28 = dma.hbm_to_vmem [thread:$0]  %s6456_s0, 2048, %s26_s18, [#allocation3]  }
  0x37   :  { %s6184_s15 = smov [#allocation7]   ;;  %s6057_s20 = scalar_lea.hbm %s6458_s2, 4096 }
  0x38   :  { %s46_s16 = sshll.u32 %s6184_s15, 4  ;;  %p6058_p10 = scmp.ne.s32.totalorder %s6458_s2, %s6057_s20  ;;  %s47_s16 = int_to_ptr.vmem [resolvable:$true] %s46_s16 }
  0x39   :  { %p6061_p11 = scmp.lt.u32.totalorder %s6057_s20, %s6458_s2 }
  0x3b   :  { %p6063_p12 = pnand %p6061_p11, %p6058_p10 }
  0x3d   :  { %6066 = shalt.err (!%p6063_p12)
}
  0x3e   :  { %s6067_s26 = scalar_lea.vmem %s47_s16, 4096  ;;  %p6072_p0 = scmp.lt.s32.totalorder %s47_s16, %s47_s16 }
  0x3f   :  { %p6068_p13 = scmp.ne.s32.totalorder %s47_s16, %s6067_s26  ;;  %p6073_p1 = scmp.lt.s32.totalorder %s6067_s26, %s6067_s26 }
  0x41   :  { %p6074_p2 = por %p6073_p1, %p6072_p0 }
  0x43   :  { %p6075_p3 = pnand %p6074_p2, %p6068_p13 }
  0x45   :  { %6078 = shalt.err (!%p6075_p3)
}
  0x46   :  { %s6185_s0 = smov 64   ;;  %s6186_s18 = smov 4  }
  0x47   :  { %52 = dma.hbm_to_vmem [thread:$0]  %s6458_s2, 4096, %s47_s16, [#allocation6], %s6185_s0, %s6185_s0, %s6186_s18  }
  0x48   :  { %s6187_s27 = smov [#allocation10]   ;;  %s6188_s29 = smov [#allocation11]  }
  0x49   :  { %s69_s28 = sshll.u32 %s6187_s27, 4  ;;  %s79_s30 = sshll.u32 %s6188_s29, 4  ;;  %s70_s28 = int_to_ptr.vmem [resolvable:$true] %s69_s28  ;;  %s80_s30 = int_to_ptr.vmem [resolvable:$true] %s79_s30 }
  0x4a   :  { %s6079_s10 = scalar_lea.hbm %s6460_s4, 64 }
  0x4b   :  { %p6080_p4 = scmp.ne.s32.totalorder %s6460_s4, %s6079_s10  ;;  %p6083_p5 = scmp.lt.u32.totalorder %s6079_s10, %s6460_s4 }
  0x4d   :  { %p6085_p6 = pnand %p6083_p5, %p6080_p4 }
  0x4f   :  { %6088 = shalt.err (!%p6085_p6)
}
  0x50   :  { %s6089_s2 = scalar_lea.vmem %s70_s28, 64  ;;  %p6094_p8 = scmp.lt.s32.totalorder %s70_s28, %s70_s28 }
  0x51   :  { %p6090_p7 = scmp.ne.s32.totalorder %s70_s28, %s6089_s2  ;;  %p6095_p9 = scmp.lt.s32.totalorder %s6089_s2, %s6089_s2 }
  0x53   :  { %p6096_p10 = por %p6095_p9, %p6094_p8 }
  0x55   :  { %p6097_p11 = pnand %p6096_p10, %p6090_p7 }
  0x57   :  { %6100 = shalt.err (!%p6097_p11)
}
  0x58   :  { %72 = dma.hbm_to_vmem [thread:$0]  %s6460_s4, 64, %s70_s28, [#allocation9]  }
  0x59   :  { %s6101_s19 = scalar_lea.hbm %s6461_s5, 64 }
  0x5a   :  { %p6102_p12 = scmp.ne.s32.totalorder %s6461_s5, %s6101_s19  ;;  %p6105_p13 = scmp.lt.u32.totalorder %s6101_s19, %s6461_s5 }
  0x5c   :  { %p6107_p0 = pnand %p6105_p13, %p6102_p12 }
  0x5e   :  { %6110 = shalt.err (!%p6107_p0)
}
  0x5f   :  { %s6111_s24 = scalar_lea.vmem %s80_s30, 64  ;;  %p6116_p2 = scmp.lt.s32.totalorder %s80_s30, %s80_s30 }
  0x60   :  { %p6112_p1 = scmp.ne.s32.totalorder %s80_s30, %s6111_s24  ;;  %p6117_p3 = scmp.lt.s32.totalorder %s6111_s24, %s6111_s24 }
  0x62   :  { %p6118_p4 = por %p6117_p3, %p6116_p2 }
  0x64   :  { %p6119_p5 = pnand %p6118_p4, %p6112_p1 }
  0x66   :  { %6122 = shalt.err (!%p6119_p5)
}
  0x67   :  { %82 = dma.hbm_to_vmem [thread:$0]  %s6461_s5, 64, %s80_s30, [#allocation12]  }
  0x68   :  { %6167 = dma.done.wait [#allocation3], 2048  }
  0x69   :  { %6168 = vsyncadd [#allocation3], 4294965248 }
  0x6a   :  { %6169 = dma.done.wait [#allocation6], 69632  }
  0x6b   :  { %6170 = vsyncadd [#allocation6], 4294897664 }
  0x6c   :  { %6171 = dma.done.wait [#allocation9], 80  }
  0x6d   :  { %6172 = vsyncadd [#allocation9], 4294967216 }
  0x6e   :  { %6173 = dma.done.wait [#allocation12], 64  }
  0x6f   :  { %6174 = vsyncadd [#allocation12], 4294967232  ;;  %v5166_v0 = vld [vmem:[#allocation5 + $0x4] ss:$16 sps:$4 sm:$0xff]   ;;  %v5168_v1 = vld [vmem:[#allocation5 + $0xc] ss:$16 sps:$4 sm:$0xff]  }
  0x70   :  { %3206 = vmatprep.subr.bf16.mxu0 %v5166_v0  ;;  %v5170_v2 = vld [vmem:[#allocation5] ss:$16 sps:$4 sm:$0xff]   ;;  %v5171_v3 = vld [vmem:[#allocation5 + $0x8] ss:$16 sps:$4 sm:$0xff]   ;;  %3534 = vmatprep.subr.bf16.mxu1 %v5168_v1  ;;  %v5172_v4 = vld [vmem:[#allocation5 + $0x24] ss:$16 sps:$4 sm:$0xff]  }
  0x71   :  { %3207 = vmatpush1.bf16.msra.mxu0 %v5170_v2  ;;  %3535 = vmatpush1.bf16.msra.mxu1 %v5171_v3  ;;  %v5174_v5 = vld [vmem:[#allocation5 + $0x2c] ss:$16 sps:$4 sm:$0xff]   ;;  %v5176_v6 = vld [vmem:[#allocation5 + $0x20] ss:$16 sps:$4 sm:$0xff]   ;;  %v5177_v7 = vld [vmem:[#allocation5 + $0x28] ss:$16 sps:$4 sm:$0xff]  }
  0x72   :  { %3208 = vmatprep.subr.bf16.mxu0 %v5172_v4  ;;  %3536 = vmatprep.subr.bf16.mxu1 %v5174_v5  ;;  %v5178_v8 = vld [vmem:[#allocation5 + $0x44] ss:$16 sps:$4 sm:$0xff]   ;;  %v5180_v9 = vld [vmem:[#allocation5 + $0x4c] ss:$16 sps:$4 sm:$0xff]   ;;  %v5182_v10 = vld [vmem:[#allocation5 + $0x40] ss:$16 sps:$4 sm:$0xff]  }
  0x73   :  { %v5183_v11 = vld [vmem:[#allocation5 + $0x48] ss:$16 sps:$4 sm:$0xff]   ;;  %v5184_v12 = vld [vmem:[#allocation5 + $0x64] ss:$16 sps:$4 sm:$0xff]   ;;  %v5186_v13 = vld [vmem:[#allocation5 + $0x6c] ss:$16 sps:$4 sm:$0xff]  }
  0x74   :  { %v5188_v14 = vld [vmem:[#allocation5 + $0x60] ss:$16 sps:$4 sm:$0xff]   ;;  %v5189_v15 = vld [vmem:[#allocation5 + $0x68] ss:$16 sps:$4 sm:$0xff]   ;;  %v5190_v16 = vld [vmem:[#allocation5 + $0x84] ss:$16 sps:$4 sm:$0xff]  }
  0x75   :  { %3209 = vmatpush1.bf16.msra.mxu0 %v5176_v6  ;;  %3537 = vmatpush1.bf16.msra.mxu1 %v5177_v7  ;;  %v5192_v17 = vld [vmem:[#allocation5 + $0x8c] ss:$16 sps:$4 sm:$0xff]   ;;  %v5194_v18 = vld [vmem:[#allocation5 + $0x80] ss:$16 sps:$4 sm:$0xff]   ;;  %v5195_v19 = vld [vmem:[#allocation5 + $0x88] ss:$16 sps:$4 sm:$0xff]  }
  0x76   :  { %3210 = vmatprep.subr.bf16.mxu0 %v5178_v8  ;;  %3538 = vmatprep.subr.bf16.mxu1 %v5180_v9  ;;  %v5196_v20 = vld [vmem:[#allocation5 + $0xa4] ss:$16 sps:$4 sm:$0xff]   ;;  %v5198_v21 = vld [vmem:[#allocation5 + $0xac] ss:$16 sps:$4 sm:$0xff]   ;;  %v5200_v22 = vld [vmem:[#allocation5 + $0xa0] ss:$16 sps:$4 sm:$0xff]  }
  0x77   :  { %v5201_v23 = vld [vmem:[#allocation5 + $0xa8] ss:$16 sps:$4 sm:$0xff]   ;;  %v5202_v24 = vld [vmem:[#allocation5 + $0xc4] ss:$16 sps:$4 sm:$0xff]   ;;  %v5204_v25 = vld [vmem:[#allocation5 + $0xcc] ss:$16 sps:$4 sm:$0xff]  }
  0x78   :  { %v5206_v26 = vld [vmem:[#allocation5 + $0xc0] ss:$16 sps:$4 sm:$0xff]   ;;  %v5207_v27 = vld [vmem:[#allocation5 + $0xc8] ss:$16 sps:$4 sm:$0xff]   ;;  %v5208_v28 = vld [vmem:[#allocation5 + $0xe4] ss:$16 sps:$4 sm:$0xff]  }
  0x79   :  { %3211 = vmatpush1.bf16.msra.mxu0 %v5182_v10  ;;  %3539 = vmatpush1.bf16.msra.mxu1 %v5183_v11  ;;  %v5210_v29 = vld [vmem:[#allocation5 + $0xec] ss:$16 sps:$4 sm:$0xff]   ;;  %v5212_v30 = vld [vmem:[#allocation5 + $0xe0] ss:$16 sps:$4 sm:$0xff]   ;;  %v5213_v31 = vld [vmem:[#allocation5 + $0xe8] ss:$16 sps:$4 sm:$0xff]  }
  0x7a   :  { %3212 = vmatprep.subr.bf16.mxu0 %v5184_v12  ;;  %3540 = vmatprep.subr.bf16.mxu1 %v5186_v13  ;;  %v5214_v32 = vld [vmem:[#allocation5 + $0x104] ss:$16 sps:$4 sm:$0xff]   ;;  %v5216_v33 = vld [vmem:[#allocation5 + $0x10c] ss:$16 sps:$4 sm:$0xff]   ;;  %v5218_v34 = vld [vmem:[#allocation5 + $0x100] ss:$16 sps:$4 sm:$0xff]  }
  0x7b   :  { %v5219_v35 = vld [vmem:[#allocation5 + $0x108] ss:$16 sps:$4 sm:$0xff]   ;;  %v5220_v36 = vld [vmem:[#allocation5 + $0x124] ss:$16 sps:$4 sm:$0xff]   ;;  %v5222_v37 = vld [vmem:[#allocation5 + $0x12c] ss:$16 sps:$4 sm:$0xff]  }
  0x7c   :  { %v5224_v38 = vld [vmem:[#allocation5 + $0x120] ss:$16 sps:$4 sm:$0xff]   ;;  %v5225_v39 = vld [vmem:[#allocation5 + $0x128] ss:$16 sps:$4 sm:$0xff]   ;;  %v5226_v40 = vld [vmem:[#allocation5 + $0x144] ss:$16 sps:$4 sm:$0xff]  }
  0x7d   :  { %3213 = vmatpush1.bf16.msra.mxu0 %v5188_v14  ;;  %3541 = vmatpush1.bf16.msra.mxu1 %v5189_v15  ;;  %v5228_v41 = vld [vmem:[#allocation5 + $0x14c] ss:$16 sps:$4 sm:$0xff]   ;;  %v5230_v42 = vld [vmem:[#allocation5 + $0x140] ss:$16 sps:$4 sm:$0xff]   ;;  %v5231_v43 = vld [vmem:[#allocation5 + $0x148] ss:$16 sps:$4 sm:$0xff]  }
  0x7e   :  { %3214 = vmatprep.subr.bf16.mxu0 %v5190_v16  ;;  %3542 = vmatprep.subr.bf16.mxu1 %v5192_v17  ;;  %v5232_v44 = vld [vmem:[#allocation5 + $0x164] ss:$16 sps:$4 sm:$0xff]   ;;  %v5234_v45 = vld [vmem:[#allocation5 + $0x16c] ss:$16 sps:$4 sm:$0xff]   ;;  %v5236_v47 = vld [vmem:[#allocation5 + $0x160] ss:$16 sps:$4 sm:$0xff]  }
  0x7f   :  { %v103_v46 = vld [vmem:[#allocation2 + $0x8] sm:$0xff]  ;;  %v5238_v50 = vld [vmem:[#allocation5 + $0x184] ss:$16 sps:$4 sm:$0xff]   ;;  %v5242_v52 = vld [vmem:[#allocation5 + $0x180] ss:$16 sps:$4 sm:$0xff]   ;;  %s6190_s5 = smov [#allocation14]  }
  0x80   :  { %v119_v48 = vpack.c.bf16 %v103_v46, %v103_v46  ;;  %v5237_v49 = vld [vmem:[#allocation5 + $0x168] ss:$16 sps:$4 sm:$0xff]   ;;  %v5240_v51 = vld [vmem:[#allocation5 + $0x18c] ss:$16 sps:$4 sm:$0xff]   ;;  %v5244_v54 = vld [vmem:[#allocation5 + $0x1a4] ss:$16 sps:$4 sm:$0xff]  }
  0x81   :  { %3215 = vmatpush1.bf16.msra.mxu0 %v5194_v18  ;;  %3543 = vmatpush1.bf16.msra.mxu1 %v5195_v19  ;;  %v5243_v53 = vld [vmem:[#allocation5 + $0x188] ss:$16 sps:$4 sm:$0xff]   ;;  %v5246_v55 = vld [vmem:[#allocation5 + $0x1ac] ss:$16 sps:$4 sm:$0xff]   ;;  %v5248_v56 = vld [vmem:[#allocation5 + $0x1a0] ss:$16 sps:$4 sm:$0xff]  }
  0x82   :  { %3216 = vmatprep.subr.bf16.mxu0 %v5196_v20  ;;  %3544 = vmatprep.subr.bf16.mxu1 %v5198_v21  ;;  %v5249_v57 = vld [vmem:[#allocation5 + $0x1a8] ss:$16 sps:$4 sm:$0xff]   ;;  %v5250_v58 = vld [vmem:[#allocation5 + $0x1c4] ss:$16 sps:$4 sm:$0xff]   ;;  %v5252_v59 = vld [vmem:[#allocation5 + $0x1cc] ss:$16 sps:$4 sm:$0xff]  }
  0x83   :  { %3238 = vmatprep.mubr.bf16.mxu0 %v119_v48  ;;  %3566 = vmatprep.mubr.bf16.mxu1 %v119_v48  ;;  %v5254_v60 = vld [vmem:[#allocation5 + $0x1c0] ss:$16 sps:$4 sm:$0xff]   ;;  %v5255_v61 = vld [vmem:[#allocation5 + $0x1c8] ss:$16 sps:$4 sm:$0xff]   ;;  %v5256_v62 = vld [vmem:[#allocation5 + $0x1e4] ss:$16 sps:$4 sm:$0xff]  }
  0x84   :  { %v5258_v63 = vld [vmem:[#allocation5 + $0x1ec] ss:$16 sps:$4 sm:$0xff]   ;;  %v5260_v0 = vld [vmem:[#allocation5 + $0x1e0] ss:$16 sps:$4 sm:$0xff]   ;;  %v5261_v1 = vld [vmem:[#allocation5 + $0x1e8] ss:$16 sps:$4 sm:$0xff]  }
  0x85   :  { %3217 = vmatpush1.bf16.msra.mxu0 %v5200_v22  ;;  %3545 = vmatpush1.bf16.msra.mxu1 %v5201_v23  ;;  %v102_v2 = vld [vmem:[#allocation2] sm:$0xff]  ;;  %v5267_v4 = vld [vmem:[#allocation5 + $0x20c] ss:$16 sps:$4 sm:$0xff]   ;;  %v5265_v7 = vld [vmem:[#allocation5 + $0x208] ss:$16 sps:$4 sm:$0xff]   ;;  %s4492_s0 = sshll.u32 %s6190_s5, 4  ;;  %s4493_s0 = int_to_ptr.vmem [resolvable:$true] %s4492_s0 }
  0x86   :  { %3218 = vmatprep.subr.bf16.mxu0 %v5202_v24  ;;  %3546 = vmatprep.subr.bf16.mxu1 %v5204_v25  ;;  %v5264_v3 = vld [vmem:[#allocation5 + $0x204] ss:$16 sps:$4 sm:$0xff]   ;;  %v118_v5 = vpack.c.bf16 %v102_v2, %v102_v2  ;;  %v5262_v6 = vld [vmem:[#allocation5 + $0x200] ss:$16 sps:$4 sm:$0xff]   ;;  %v5273_v9 = vld [vmem:[#allocation5 + $0x22c] ss:$16 sps:$4 sm:$0xff]   ;;  %p6128_p7 = scmp.lt.s32.totalorder %s4493_s0, %s4493_s0 }
  0x87   :  { %v5270_v8 = vld [vmem:[#allocation5 + $0x224] ss:$16 sps:$4 sm:$0xff]   ;;  %v5268_v10 = vld [vmem:[#allocation5 + $0x220] ss:$16 sps:$4 sm:$0xff]   ;;  %v5271_v11 = vld [vmem:[#allocation5 + $0x228] ss:$16 sps:$4 sm:$0xff]  }
  0x88   :  { %v5276_v12 = vld [vmem:[#allocation5 + $0x244] ss:$16 sps:$4 sm:$0xff]   ;;  %v5279_v13 = vld [vmem:[#allocation5 + $0x24c] ss:$16 sps:$4 sm:$0xff]   ;;  %v5274_v14 = vld [vmem:[#allocation5 + $0x240] ss:$16 sps:$4 sm:$0xff]  }
  0x89   :  { %3219 = vmatpush1.bf16.msra.mxu0 %v5206_v26  ;;  %3547 = vmatpush1.bf16.msra.mxu1 %v5207_v27  ;;  %v5277_v15 = vld [vmem:[#allocation5 + $0x248] ss:$16 sps:$4 sm:$0xff]   ;;  %v5282_v16 = vld [vmem:[#allocation5 + $0x264] ss:$16 sps:$4 sm:$0xff]   ;;  %v5285_v17 = vld [vmem:[#allocation5 + $0x26c] ss:$16 sps:$4 sm:$0xff]  }
  0x8a   :  { %3220 = vmatprep.subr.bf16.mxu0 %v5208_v28  ;;  %3548 = vmatprep.subr.bf16.mxu1 %v5210_v29  ;;  %v5280_v18 = vld [vmem:[#allocation5 + $0x260] ss:$16 sps:$4 sm:$0xff]   ;;  %v5283_v19 = vld [vmem:[#allocation5 + $0x268] ss:$16 sps:$4 sm:$0xff]   ;;  %v5288_v20 = vld [vmem:[#allocation5 + $0x284] ss:$16 sps:$4 sm:$0xff]  }
  0x8b   :  { %v5291_v21 = vld [vmem:[#allocation5 + $0x28c] ss:$16 sps:$4 sm:$0xff]   ;;  %v5286_v22 = vld [vmem:[#allocation5 + $0x280] ss:$16 sps:$4 sm:$0xff]   ;;  %v5289_v23 = vld [vmem:[#allocation5 + $0x288] ss:$16 sps:$4 sm:$0xff]  }
  0x8c   :  { %v5294_v24 = vld [vmem:[#allocation5 + $0x2a4] ss:$16 sps:$4 sm:$0xff]   ;;  %v5297_v25 = vld [vmem:[#allocation5 + $0x2ac] ss:$16 sps:$4 sm:$0xff]   ;;  %v5292_v26 = vld [vmem:[#allocation5 + $0x2a0] ss:$16 sps:$4 sm:$0xff]  }
  0x8d   :  { %3221 = vmatpush1.bf16.msra.mxu0 %v5212_v30  ;;  %3549 = vmatpush1.bf16.msra.mxu1 %v5213_v31  ;;  %v5295_v27 = vld [vmem:[#allocation5 + $0x2a8] ss:$16 sps:$4 sm:$0xff]   ;;  %v5300_v28 = vld [vmem:[#allocation5 + $0x2c4] ss:$16 sps:$4 sm:$0xff]   ;;  %v5303_v29 = vld [vmem:[#allocation5 + $0x2cc] ss:$16 sps:$4 sm:$0xff]  }
  0x8e   :  { %3222 = vmatprep.subr.bf16.mxu0 %v5214_v32  ;;  %3550 = vmatprep.subr.bf16.mxu1 %v5216_v33  ;;  %v105_v30 = vld [vmem:[#allocation2 + $0x18] sm:$0xff]  ;;  %v5298_v31 = vld [vmem:[#allocation5 + $0x2c0] ss:$16 sps:$4 sm:$0xff]   ;;  %v5324_v46 = vld [vmem:[#allocation5 + $0x344] ss:$16 sps:$4 sm:$0xff]   ;;  %s6123_s18 = scalar_lea.vmem %s4493_s0, 128 }
  0x8f   :  { %v121_v32 = vpack.c.bf16 %v105_v30, %v105_v30  ;;  %v5301_v33 = vld [vmem:[#allocation5 + $0x2c8] ss:$16 sps:$4 sm:$0xff]   ;;  %v5322_v48 = vld [vmem:[#allocation5 + $0x340] ss:$16 sps:$4 sm:$0xff]   ;;  %v5354_v2 = vld [vmem:[#allocation5 + $0x3e4] ss:$16 sps:$4 sm:$0xff]   ;;  %p6124_p6 = scmp.ne.s32.totalorder %s4493_s0, %s6123_s18  ;;  %p6129_p8 = scmp.lt.s32.totalorder %s6123_s18, %s6123_s18 }
  0x90   :  { %v5390_v30 = vld [vmem:[#allocation5 + $0x4a4] ss:$16 sps:$4 sm:$0xff]  }
  0x91   :  { %3223 = vmatpush1.bf16.msra.mxu0 %v5218_v34  ;;  %3551 = vmatpush1.bf16.msra.mxu1 %v5219_v35  ;;  %v5306_v34 = vld [vmem:[#allocation5 + $0x2e4] ss:$16 sps:$4 sm:$0xff]   ;;  %v5309_v35 = vld [vmem:[#allocation5 + $0x2ec] ss:$16 sps:$4 sm:$0xff]   ;;  %p6130_p9 = por %p6129_p8, %p6128_p7 }
  0x92   :  { %3224 = vmatprep.subr.bf16.mxu0 %v5220_v36  ;;  %3552 = vmatprep.subr.bf16.mxu1 %v5222_v37  ;;  %v5304_v36 = vld [vmem:[#allocation5 + $0x2e0] ss:$16 sps:$4 sm:$0xff]   ;;  %v5307_v37 = vld [vmem:[#allocation5 + $0x2e8] ss:$16 sps:$4 sm:$0xff]  }
  0x93   :  { %p6131_p10 = pnand %p6130_p9, %p6124_p6 }
  0x95   :  { %3225 = vmatpush1.bf16.msra.mxu0 %v5224_v38  ;;  %3553 = vmatpush1.bf16.msra.mxu1 %v5225_v39  ;;  %v5312_v38 = vld [vmem:[#allocation5 + $0x304] ss:$16 sps:$4 sm:$0xff]   ;;  %v5315_v39 = vld [vmem:[#allocation5 + $0x30c] ss:$16 sps:$4 sm:$0xff]  }
  0x96   :  { %3226 = vmatprep.subr.bf16.mxu0 %v5226_v40  ;;  %3554 = vmatprep.subr.bf16.mxu1 %v5228_v41  ;;  %v5310_v40 = vld [vmem:[#allocation5 + $0x300] ss:$16 sps:$4 sm:$0xff]   ;;  %v5313_v41 = vld [vmem:[#allocation5 + $0x308] ss:$16 sps:$4 sm:$0xff]  }
  0x99   :  { %3227 = vmatpush1.bf16.msra.mxu0 %v5230_v42  ;;  %3555 = vmatpush1.bf16.msra.mxu1 %v5231_v43  ;;  %v5318_v42 = vld [vmem:[#allocation5 + $0x324] ss:$16 sps:$4 sm:$0xff]   ;;  %v5321_v43 = vld [vmem:[#allocation5 + $0x32c] ss:$16 sps:$4 sm:$0xff]  }
  0x9a   :  { %3228 = vmatprep.subr.bf16.mxu0 %v5232_v44  ;;  %3556 = vmatprep.subr.bf16.mxu1 %v5234_v45  ;;  %v5316_v44 = vld [vmem:[#allocation5 + $0x320] ss:$16 sps:$4 sm:$0xff]   ;;  %v5319_v45 = vld [vmem:[#allocation5 + $0x328] ss:$16 sps:$4 sm:$0xff]  }
  0x9d   :  { %3229 = vmatpush1.bf16.msra.mxu0 %v5236_v47  ;;  %3557 = vmatpush1.bf16.msra.mxu1 %v5237_v49  ;;  %v5327_v47 = vld [vmem:[#allocation5 + $0x34c] ss:$16 sps:$4 sm:$0xff]   ;;  %v5325_v49 = vld [vmem:[#allocation5 + $0x348] ss:$16 sps:$4 sm:$0xff]  }
  0x9e   :  { %3230 = vmatprep.subr.bf16.mxu0 %v5238_v50  ;;  %3558 = vmatprep.subr.bf16.mxu1 %v5240_v51  ;;  %v5330_v50 = vld [vmem:[#allocation5 + $0x364] ss:$16 sps:$4 sm:$0xff]   ;;  %v5333_v51 = vld [vmem:[#allocation5 + $0x36c] ss:$16 sps:$4 sm:$0xff]  }
  0xa1   :  { %3231 = vmatpush1.bf16.msra.mxu0 %v5242_v52  ;;  %3559 = vmatpush1.bf16.msra.mxu1 %v5243_v53  ;;  %v5328_v52 = vld [vmem:[#allocation5 + $0x360] ss:$16 sps:$4 sm:$0xff]   ;;  %v5331_v53 = vld [vmem:[#allocation5 + $0x368] ss:$16 sps:$4 sm:$0xff]  }
  0xa2   :  { %3232 = vmatprep.subr.bf16.mxu0 %v5244_v54  ;;  %3560 = vmatprep.subr.bf16.mxu1 %v5246_v55  ;;  %v5336_v54 = vld [vmem:[#allocation5 + $0x384] ss:$16 sps:$4 sm:$0xff]   ;;  %v5339_v55 = vld [vmem:[#allocation5 + $0x38c] ss:$16 sps:$4 sm:$0xff]  }
  0xa5   :  { %3233 = vmatpush1.bf16.msra.mxu0 %v5248_v56  ;;  %3561 = vmatpush1.bf16.msra.mxu1 %v5249_v57  ;;  %v5334_v56 = vld [vmem:[#allocation5 + $0x380] ss:$16 sps:$4 sm:$0xff]   ;;  %v5337_v57 = vld [vmem:[#allocation5 + $0x388] ss:$16 sps:$4 sm:$0xff]  }
  0xa6   :  { %3234 = vmatprep.subr.bf16.mxu0 %v5250_v58  ;;  %3562 = vmatprep.subr.bf16.mxu1 %v5252_v59  ;;  %v5342_v58 = vld [vmem:[#allocation5 + $0x3a4] ss:$16 sps:$4 sm:$0xff]   ;;  %v5345_v59 = vld [vmem:[#allocation5 + $0x3ac] ss:$16 sps:$4 sm:$0xff]  }
  0xa9   :  { %3235 = vmatpush1.bf16.msra.mxu0 %v5254_v60  ;;  %3563 = vmatpush1.bf16.msra.mxu1 %v5255_v61  ;;  %v5340_v60 = vld [vmem:[#allocation5 + $0x3a0] ss:$16 sps:$4 sm:$0xff]   ;;  %v5343_v61 = vld [vmem:[#allocation5 + $0x3a8] ss:$16 sps:$4 sm:$0xff]  }
  0xaa   :  { %3236 = vmatprep.subr.bf16.mxu0 %v5256_v62  ;;  %3564 = vmatprep.subr.bf16.mxu1 %v5258_v63  ;;  %v5348_v62 = vld [vmem:[#allocation5 + $0x3c4] ss:$16 sps:$4 sm:$0xff]   ;;  %v5351_v63 = vld [vmem:[#allocation5 + $0x3cc] ss:$16 sps:$4 sm:$0xff]  }
  0xad   :  { %3237 = vmatpush1.bf16.msra.mxu0 %v5260_v0  ;;  %3565 = vmatpush1.bf16.msra.mxu1 %v5261_v1  ;;  %v5346_v0 = vld [vmem:[#allocation5 + $0x3c0] ss:$16 sps:$4 sm:$0xff]   ;;  %v5349_v1 = vld [vmem:[#allocation5 + $0x3c8] ss:$16 sps:$4 sm:$0xff]  }
  0xae   :  { %3247 = vmatprep.subr.bf16.mxu0 %v5264_v3  ;;  %3575 = vmatprep.subr.bf16.mxu1 %v5267_v4  ;;  %v5357_v3 = vld [vmem:[#allocation5 + $0x3ec] ss:$16 sps:$4 sm:$0xff]   ;;  %v5352_v4 = vld [vmem:[#allocation5 + $0x3e0] ss:$16 sps:$4 sm:$0xff]  }
  0xb0   :  { %3239 = vmatmul.mubr.bf16.vlgmr.msra.gmra.mrb[0].mxu0 %v118_v5  ;;  %3567 = vmatmul.mubr.bf16.vlgmr.msra.gmra.mrb[0].mxu1 %v118_v5  ;;  %v5355_v5 = vld [vmem:[#allocation5 + $0x3e8] ss:$16 sps:$4 sm:$0xff]  }
  0xb1   :  { %3248 = vmatpush1.bf16.msra.mxu0 %v5262_v6  ;;  %3576 = vmatpush1.bf16.msra.mxu1 %v5265_v7  ;;  %v5360_v6 = vld [vmem:[#allocation5 + $0x404] ss:$16 sps:$4 sm:$0xff]  }
  0xb2   :  { %3249 = vmatprep.subr.bf16.mxu0 %v5270_v8  ;;  %3577 = vmatprep.subr.bf16.mxu1 %v5273_v9  ;;  %v104_v7 = vld [vmem:[#allocation2 + $0x10] sm:$0xff]  ;;  %v5363_v8 = vld [vmem:[#allocation5 + $0x40c] ss:$16 sps:$4 sm:$0xff]  }
  0xb3   :  { %3279 = vmatprep.mubr.bf16.mxu0 %v121_v32  ;;  %3607 = vmatprep.mubr.bf16.mxu1 %v121_v32  ;;  %v5358_v9 = vld [vmem:[#allocation5 + $0x400] ss:$16 sps:$4 sm:$0xff]  }
  0xb4   :  { %v5388_v32 = vld [vmem:[#allocation5 + $0x4a0] ss:$16 sps:$4 sm:$0xff]  }
  0xb5   :  { %3250 = vmatpush1.bf16.msra.mxu0 %v5268_v10  ;;  %3578 = vmatpush1.bf16.msra.mxu1 %v5271_v11  ;;  %v5361_v10 = vld [vmem:[#allocation5 + $0x408] ss:$16 sps:$4 sm:$0xff]   ;;  %v120_v11 = vpack.c.bf16 %v104_v7, %v104_v7  ;;  %v5453_v7 = vld [vmem:[#allocation5 + $0x5ec] ss:$16 sps:$4 sm:$0xff]  }
  0xb6   :  { %3251 = vmatprep.subr.bf16.mxu0 %v5276_v12  ;;  %3579 = vmatprep.subr.bf16.mxu1 %v5279_v13  ;;  %v5366_v12 = vld [vmem:[#allocation5 + $0x424] ss:$16 sps:$4 sm:$0xff]   ;;  %v5369_v13 = vld [vmem:[#allocation5 + $0x42c] ss:$16 sps:$4 sm:$0xff]  }
  0xb9   :  { %3252 = vmatpush1.bf16.msra.mxu0 %v5274_v14  ;;  %3580 = vmatpush1.bf16.msra.mxu1 %v5277_v15  ;;  %v107_v14 = vld [vmem:[#allocation2 + $0x28] sm:$0xff] }
  0xba   :  { %3253 = vmatprep.subr.bf16.mxu0 %v5282_v16  ;;  %3581 = vmatprep.subr.bf16.mxu1 %v5285_v17  ;;  %v123_v15 = vpack.c.bf16 %v107_v14, %v107_v14  ;;  %v5364_v16 = vld [vmem:[#allocation5 + $0x420] ss:$16 sps:$4 sm:$0xff]   ;;  %v5367_v17 = vld [vmem:[#allocation5 + $0x428] ss:$16 sps:$4 sm:$0xff]  }
  0xbb   :  { %v5457_v14 = vld [vmem:[#allocation5 + $0x608] ss:$16 sps:$4 sm:$0xff]  }
  0xbd   :  { %3254 = vmatpush1.bf16.msra.mxu0 %v5280_v18  ;;  %3582 = vmatpush1.bf16.msra.mxu1 %v5283_v19  ;;  %v5372_v18 = vld [vmem:[#allocation5 + $0x444] ss:$16 sps:$4 sm:$0xff]   ;;  %v5375_v19 = vld [vmem:[#allocation5 + $0x44c] ss:$16 sps:$4 sm:$0xff]  }
  0xbe   :  { %3255 = vmatprep.subr.bf16.mxu0 %v5288_v20  ;;  %3583 = vmatprep.subr.bf16.mxu1 %v5291_v21  ;;  %v5370_v20 = vld [vmem:[#allocation5 + $0x440] ss:$16 sps:$4 sm:$0xff]   ;;  %v5373_v21 = vld [vmem:[#allocation5 + $0x448] ss:$16 sps:$4 sm:$0xff]  }
  0xc1   :  { %3256 = vmatpush1.bf16.msra.mxu0 %v5286_v22  ;;  %3584 = vmatpush1.bf16.msra.mxu1 %v5289_v23  ;;  %v5378_v22 = vld [vmem:[#allocation5 + $0x464] ss:$16 sps:$4 sm:$0xff]   ;;  %v5381_v23 = vld [vmem:[#allocation5 + $0x46c] ss:$16 sps:$4 sm:$0xff]  }
  0xc2   :  { %3257 = vmatprep.subr.bf16.mxu0 %v5294_v24  ;;  %3585 = vmatprep.subr.bf16.mxu1 %v5297_v25  ;;  %v5376_v24 = vld [vmem:[#allocation5 + $0x460] ss:$16 sps:$4 sm:$0xff]   ;;  %v5379_v25 = vld [vmem:[#allocation5 + $0x468] ss:$16 sps:$4 sm:$0xff]  }
  0xc5   :  { %3258 = vmatpush1.bf16.msra.mxu0 %v5292_v26  ;;  %3586 = vmatpush1.bf16.msra.mxu1 %v5295_v27  ;;  %v5384_v26 = vld [vmem:[#allocation5 + $0x484] ss:$16 sps:$4 sm:$0xff]   ;;  %v5387_v27 = vld [vmem:[#allocation5 + $0x48c] ss:$16 sps:$4 sm:$0xff]  }
  0xc6   :  { %3259 = vmatprep.subr.bf16.mxu0 %v5300_v28  ;;  %3587 = vmatprep.subr.bf16.mxu1 %v5303_v29  ;;  %v5382_v28 = vld [vmem:[#allocation5 + $0x480] ss:$16 sps:$4 sm:$0xff]   ;;  %v5385_v29 = vld [vmem:[#allocation5 + $0x488] ss:$16 sps:$4 sm:$0xff]  }
  0xc9   :  { %3260 = vmatpush1.bf16.msra.mxu0 %v5298_v31  ;;  %3588 = vmatpush1.bf16.msra.mxu1 %v5301_v33  ;;  %v5393_v31 = vld [vmem:[#allocation5 + $0x4ac] ss:$16 sps:$4 sm:$0xff]   ;;  %v5391_v33 = vld [vmem:[#allocation5 + $0x4a8] ss:$16 sps:$4 sm:$0xff]  }
  0xca   :  { %3261 = vmatprep.subr.bf16.mxu0 %v5306_v34  ;;  %3589 = vmatprep.subr.bf16.mxu1 %v5309_v35  ;;  %v5396_v34 = vld [vmem:[#allocation5 + $0x4c4] ss:$16 sps:$4 sm:$0xff]   ;;  %v5399_v35 = vld [vmem:[#allocation5 + $0x4cc] ss:$16 sps:$4 sm:$0xff]  }
  0xcd   :  { %3262 = vmatpush1.bf16.msra.mxu0 %v5304_v36  ;;  %3590 = vmatpush1.bf16.msra.mxu1 %v5307_v37  ;;  %v5394_v36 = vld [vmem:[#allocation5 + $0x4c0] ss:$16 sps:$4 sm:$0xff]   ;;  %v5397_v37 = vld [vmem:[#allocation5 + $0x4c8] ss:$16 sps:$4 sm:$0xff]  }
  0xce   :  { %3263 = vmatprep.subr.bf16.mxu0 %v5312_v38  ;;  %3591 = vmatprep.subr.bf16.mxu1 %v5315_v39  ;;  %v5402_v38 = vld [vmem:[#allocation5 + $0x4e4] ss:$16 sps:$4 sm:$0xff]   ;;  %v5405_v39 = vld [vmem:[#allocation5 + $0x4ec] ss:$16 sps:$4 sm:$0xff]  }
  0xd1   :  { %3264 = vmatpush1.bf16.msra.mxu0 %v5310_v40  ;;  %3592 = vmatpush1.bf16.msra.mxu1 %v5313_v41  ;;  %v5400_v40 = vld [vmem:[#allocation5 + $0x4e0] ss:$16 sps:$4 sm:$0xff]   ;;  %v5403_v41 = vld [vmem:[#allocation5 + $0x4e8] ss:$16 sps:$4 sm:$0xff]  }
  0xd2   :  { %3265 = vmatprep.subr.bf16.mxu0 %v5318_v42  ;;  %3593 = vmatprep.subr.bf16.mxu1 %v5321_v43  ;;  %v5408_v42 = vld [vmem:[#allocation5 + $0x504] ss:$16 sps:$4 sm:$0xff]   ;;  %v5411_v43 = vld [vmem:[#allocation5 + $0x50c] ss:$16 sps:$4 sm:$0xff]  }
  0xd5   :  { %3266 = vmatpush1.bf16.msra.mxu0 %v5316_v44  ;;  %3594 = vmatpush1.bf16.msra.mxu1 %v5319_v45  ;;  %v5406_v44 = vld [vmem:[#allocation5 + $0x500] ss:$16 sps:$4 sm:$0xff]   ;;  %v5409_v45 = vld [vmem:[#allocation5 + $0x508] ss:$16 sps:$4 sm:$0xff]  }
  0xd6   :  { %3267 = vmatprep.subr.bf16.mxu0 %v5324_v46  ;;  %3595 = vmatprep.subr.bf16.mxu1 %v5327_v47  ;;  %v5414_v46 = vld [vmem:[#allocation5 + $0x524] ss:$16 sps:$4 sm:$0xff]   ;;  %v5417_v47 = vld [vmem:[#allocation5 + $0x52c] ss:$16 sps:$4 sm:$0xff]  }
  0xd9   :  { %3268 = vmatpush1.bf16.msra.mxu0 %v5322_v48  ;;  %3596 = vmatpush1.bf16.msra.mxu1 %v5325_v49  ;;  %v5412_v48 = vld [vmem:[#allocation5 + $0x520] ss:$16 sps:$4 sm:$0xff]   ;;  %v5415_v49 = vld [vmem:[#allocation5 + $0x528] ss:$16 sps:$4 sm:$0xff]  }
  0xda   :  { %3269 = vmatprep.subr.bf16.mxu0 %v5330_v50  ;;  %3597 = vmatprep.subr.bf16.mxu1 %v5333_v51  ;;  %v5420_v50 = vld [vmem:[#allocation5 + $0x544] ss:$16 sps:$4 sm:$0xff]   ;;  %v5423_v51 = vld [vmem:[#allocation5 + $0x54c] ss:$16 sps:$4 sm:$0xff]  }
  0xdd   :  { %3270 = vmatpush1.bf16.msra.mxu0 %v5328_v52  ;;  %3598 = vmatpush1.bf16.msra.mxu1 %v5331_v53  ;;  %v5418_v52 = vld [vmem:[#allocation5 + $0x540] ss:$16 sps:$4 sm:$0xff]   ;;  %v5421_v53 = vld [vmem:[#allocation5 + $0x548] ss:$16 sps:$4 sm:$0xff]  }
  0xde   :  { %3271 = vmatprep.subr.bf16.mxu0 %v5336_v54  ;;  %3599 = vmatprep.subr.bf16.mxu1 %v5339_v55  ;;  %v5426_v54 = vld [vmem:[#allocation5 + $0x564] ss:$16 sps:$4 sm:$0xff]   ;;  %v5429_v55 = vld [vmem:[#allocation5 + $0x56c] ss:$16 sps:$4 sm:$0xff]  }
  0xe1   :  { %3272 = vmatpush1.bf16.msra.mxu0 %v5334_v56  ;;  %3600 = vmatpush1.bf16.msra.mxu1 %v5337_v57  ;;  %v5424_v56 = vld [vmem:[#allocation5 + $0x560] ss:$16 sps:$4 sm:$0xff]   ;;  %v5427_v57 = vld [vmem:[#allocation5 + $0x568] ss:$16 sps:$4 sm:$0xff]  }
  0xe2   :  { %3273 = vmatprep.subr.bf16.mxu0 %v5342_v58  ;;  %3601 = vmatprep.subr.bf16.mxu1 %v5345_v59  ;;  %v5432_v58 = vld [vmem:[#allocation5 + $0x584] ss:$16 sps:$4 sm:$0xff]   ;;  %v5435_v59 = vld [vmem:[#allocation5 + $0x58c] ss:$16 sps:$4 sm:$0xff]  }
  0xe5   :  { %3274 = vmatpush1.bf16.msra.mxu0 %v5340_v60  ;;  %3602 = vmatpush1.bf16.msra.mxu1 %v5343_v61  ;;  %v5430_v60 = vld [vmem:[#allocation5 + $0x580] ss:$16 sps:$4 sm:$0xff]   ;;  %v5433_v61 = vld [vmem:[#allocation5 + $0x588] ss:$16 sps:$4 sm:$0xff]  }
  0xe6   :  { %3275 = vmatprep.subr.bf16.mxu0 %v5348_v62  ;;  %3603 = vmatprep.subr.bf16.mxu1 %v5351_v63  ;;  %v5438_v62 = vld [vmem:[#allocation5 + $0x5a4] ss:$16 sps:$4 sm:$0xff]   ;;  %v5441_v63 = vld [vmem:[#allocation5 + $0x5ac] ss:$16 sps:$4 sm:$0xff]  }
  0xe9   :  { %3276 = vmatpush1.bf16.msra.mxu0 %v5346_v0  ;;  %3604 = vmatpush1.bf16.msra.mxu1 %v5349_v1  ;;  %v5436_v0 = vld [vmem:[#allocation5 + $0x5a0] ss:$16 sps:$4 sm:$0xff]   ;;  %v5439_v1 = vld [vmem:[#allocation5 + $0x5a8] ss:$16 sps:$4 sm:$0xff]  }
  0xea   :  { %3277 = vmatprep.subr.bf16.mxu0 %v5354_v2  ;;  %3605 = vmatprep.subr.bf16.mxu1 %v5357_v3  ;;  %v5444_v2 = vld [vmem:[#allocation5 + $0x5c4] ss:$16 sps:$4 sm:$0xff]   ;;  %v5447_v3 = vld [vmem:[#allocation5 + $0x5cc] ss:$16 sps:$4 sm:$0xff]  }
  0xed   :  { %3278 = vmatpush1.bf16.msra.mxu0 %v5352_v4  ;;  %3606 = vmatpush1.bf16.msra.mxu1 %v5355_v5  ;;  %v5442_v4 = vld [vmem:[#allocation5 + $0x5c0] ss:$16 sps:$4 sm:$0xff]   ;;  %v5445_v5 = vld [vmem:[#allocation5 + $0x5c8] ss:$16 sps:$4 sm:$0xff]  }
  0xee   :  { %3288 = vmatprep.subr.bf16.mxu0 %v5360_v6  ;;  %3616 = vmatprep.subr.bf16.mxu1 %v5363_v8  ;;  %v5450_v6 = vld [vmem:[#allocation5 + $0x5e4] ss:$16 sps:$4 sm:$0xff]   ;;  %v5448_v8 = vld [vmem:[#allocation5 + $0x5e0] ss:$16 sps:$4 sm:$0xff]  }
  0xf0   :  { %3280 = vmatmul.mubr.bf16.vlgmr.msra.gmra.mrb[0].mxu0 %v120_v11  ;;  %3608 = vmatmul.mubr.bf16.vlgmr.msra.gmra.mrb[0].mxu1 %v120_v11  ;;  %v106_v11 = vld [vmem:[#allocation2 + $0x20] sm:$0xff] }
  0xf1   :  { %3289 = vmatpush1.bf16.msra.mxu0 %v5358_v9  ;;  %3617 = vmatpush1.bf16.msra.mxu1 %v5361_v10  ;;  %v5451_v9 = vld [vmem:[#allocation5 + $0x5e8] ss:$16 sps:$4 sm:$0xff]   ;;  %v5456_v10 = vld [vmem:[#allocation5 + $0x604] ss:$16 sps:$4 sm:$0xff]  }
  0xf2   :  { %3290 = vmatprep.subr.bf16.mxu0 %v5366_v12  ;;  %3618 = vmatprep.subr.bf16.mxu1 %v5369_v13  ;;  %v5459_v12 = vld [vmem:[#allocation5 + $0x60c] ss:$16 sps:$4 sm:$0xff]   ;;  %v5454_v13 = vld [vmem:[#allocation5 + $0x600] ss:$16 sps:$4 sm:$0xff]  }
  0xf3   :  { %3320 = vmatprep.mubr.bf16.mxu0 %v123_v15  ;;  %3648 = vmatprep.mubr.bf16.mxu1 %v123_v15  ;;  %v122_v15 = vpack.c.bf16 %v106_v11, %v106_v11  ;;  %v5549_v11 = vld [vmem:[#allocation5 + $0x7ec] ss:$16 sps:$4 sm:$0xff]  }
  0xf5   :  { %3291 = vmatpush1.bf16.msra.mxu0 %v5364_v16  ;;  %3619 = vmatpush1.bf16.msra.mxu1 %v5367_v17  ;;  %v109_v16 = vld [vmem:[#allocation2 + $0x38] sm:$0xff]  ;;  %v5462_v17 = vld [vmem:[#allocation5 + $0x624] ss:$16 sps:$4 sm:$0xff]  }
  0xf6   :  { %3292 = vmatprep.subr.bf16.mxu0 %v5372_v18  ;;  %3620 = vmatprep.subr.bf16.mxu1 %v5375_v19  ;;  %v5465_v18 = vld [vmem:[#allocation5 + $0x62c] ss:$16 sps:$4 sm:$0xff]   ;;  %v125_v19 = vpack.c.bf16 %v109_v16, %v109_v16 }
  0xf7   :  { %v5555_v16 = vld [vmem:[#allocation5 + $0x80c] ss:$16 sps:$4 sm:$0xff]  }
  0xf9   :  { %3293 = vmatpush1.bf16.msra.mxu0 %v5370_v20  ;;  %3621 = vmatpush1.bf16.msra.mxu1 %v5373_v21  ;;  %v5460_v20 = vld [vmem:[#allocation5 + $0x620] ss:$16 sps:$4 sm:$0xff]   ;;  %v5463_v21 = vld [vmem:[#allocation5 + $0x628] ss:$16 sps:$4 sm:$0xff]  }
  0xfa   :  { %3294 = vmatprep.subr.bf16.mxu0 %v5378_v22  ;;  %3622 = vmatprep.subr.bf16.mxu1 %v5381_v23  ;;  %v5468_v22 = vld [vmem:[#allocation5 + $0x644] ss:$16 sps:$4 sm:$0xff]   ;;  %v5471_v23 = vld [vmem:[#allocation5 + $0x64c] ss:$16 sps:$4 sm:$0xff]  }
  0xfd   :  { %3295 = vmatpush1.bf16.msra.mxu0 %v5376_v24  ;;  %3623 = vmatpush1.bf16.msra.mxu1 %v5379_v25  ;;  %v5466_v24 = vld [vmem:[#allocation5 + $0x640] ss:$16 sps:$4 sm:$0xff]   ;;  %v5469_v25 = vld [vmem:[#allocation5 + $0x648] ss:$16 sps:$4 sm:$0xff]  }
  0xfe   :  { %3296 = vmatprep.subr.bf16.mxu0 %v5384_v26  ;;  %3624 = vmatprep.subr.bf16.mxu1 %v5387_v27  ;;  %v5474_v26 = vld [vmem:[#allocation5 + $0x664] ss:$16 sps:$4 sm:$0xff]   ;;  %v5477_v27 = vld [vmem:[#allocation5 + $0x66c] ss:$16 sps:$4 sm:$0xff]  }
 0x101   :  { %3297 = vmatpush1.bf16.msra.mxu0 %v5382_v28  ;;  %3625 = vmatpush1.bf16.msra.mxu1 %v5385_v29  ;;  %v5472_v28 = vld [vmem:[#allocation5 + $0x660] ss:$16 sps:$4 sm:$0xff]   ;;  %v5475_v29 = vld [vmem:[#allocation5 + $0x668] ss:$16 sps:$4 sm:$0xff]  }
 0x102   :  { %3298 = vmatprep.subr.bf16.mxu0 %v5390_v30  ;;  %3626 = vmatprep.subr.bf16.mxu1 %v5393_v31  ;;  %v5480_v30 = vld [vmem:[#allocation5 + $0x684] ss:$16 sps:$4 sm:$0xff]   ;;  %v5483_v31 = vld [vmem:[#allocation5 + $0x68c] ss:$16 sps:$4 sm:$0xff]  }
 0x105   :  { %3299 = vmatpush1.bf16.msra.mxu0 %v5388_v32  ;;  %3627 = vmatpush1.bf16.msra.mxu1 %v5391_v33  ;;  %v5478_v32 = vld [vmem:[#allocation5 + $0x680] ss:$16 sps:$4 sm:$0xff]   ;;  %v5481_v33 = vld [vmem:[#allocation5 + $0x688] ss:$16 sps:$4 sm:$0xff]  }
 0x106   :  { %3300 = vmatprep.subr.bf16.mxu0 %v5396_v34  ;;  %3628 = vmatprep.subr.bf16.mxu1 %v5399_v35  ;;  %v5486_v34 = vld [vmem:[#allocation5 + $0x6a4] ss:$16 sps:$4 sm:$0xff]   ;;  %v5489_v35 = vld [vmem:[#allocation5 + $0x6ac] ss:$16 sps:$4 sm:$0xff]  }
 0x109   :  { %3301 = vmatpush1.bf16.msra.mxu0 %v5394_v36  ;;  %3629 = vmatpush1.bf16.msra.mxu1 %v5397_v37  ;;  %v5484_v36 = vld [vmem:[#allocation5 + $0x6a0] ss:$16 sps:$4 sm:$0xff]   ;;  %v5487_v37 = vld [vmem:[#allocation5 + $0x6a8] ss:$16 sps:$4 sm:$0xff]  }
 0x10a   :  { %3302 = vmatprep.subr.bf16.mxu0 %v5402_v38  ;;  %3630 = vmatprep.subr.bf16.mxu1 %v5405_v39  ;;  %v5492_v38 = vld [vmem:[#allocation5 + $0x6c4] ss:$16 sps:$4 sm:$0xff]   ;;  %v5495_v39 = vld [vmem:[#allocation5 + $0x6cc] ss:$16 sps:$4 sm:$0xff]  }
 0x10d   :  { %3303 = vmatpush1.bf16.msra.mxu0 %v5400_v40  ;;  %3631 = vmatpush1.bf16.msra.mxu1 %v5403_v41  ;;  %v5490_v40 = vld [vmem:[#allocation5 + $0x6c0] ss:$16 sps:$4 sm:$0xff]   ;;  %v5493_v41 = vld [vmem:[#allocation5 + $0x6c8] ss:$16 sps:$4 sm:$0xff]  }
 0x10e   :  { %3304 = vmatprep.subr.bf16.mxu0 %v5408_v42  ;;  %3632 = vmatprep.subr.bf16.mxu1 %v5411_v43  ;;  %v5498_v42 = vld [vmem:[#allocation5 + $0x6e4] ss:$16 sps:$4 sm:$0xff]   ;;  %v5501_v43 = vld [vmem:[#allocation5 + $0x6ec] ss:$16 sps:$4 sm:$0xff]  }
 0x111   :  { %3305 = vmatpush1.bf16.msra.mxu0 %v5406_v44  ;;  %3633 = vmatpush1.bf16.msra.mxu1 %v5409_v45  ;;  %v5496_v44 = vld [vmem:[#allocation5 + $0x6e0] ss:$16 sps:$4 sm:$0xff]   ;;  %v5499_v45 = vld [vmem:[#allocation5 + $0x6e8] ss:$16 sps:$4 sm:$0xff]  }
 0x112   :  { %3306 = vmatprep.subr.bf16.mxu0 %v5414_v46  ;;  %3634 = vmatprep.subr.bf16.mxu1 %v5417_v47  ;;  %v5504_v46 = vld [vmem:[#allocation5 + $0x704] ss:$16 sps:$4 sm:$0xff]   ;;  %v5507_v47 = vld [vmem:[#allocation5 + $0x70c] ss:$16 sps:$4 sm:$0xff]  }
 0x115   :  { %3307 = vmatpush1.bf16.msra.mxu0 %v5412_v48  ;;  %3635 = vmatpush1.bf16.msra.mxu1 %v5415_v49  ;;  %v5502_v48 = vld [vmem:[#allocation5 + $0x700] ss:$16 sps:$4 sm:$0xff]   ;;  %v5505_v49 = vld [vmem:[#allocation5 + $0x708] ss:$16 sps:$4 sm:$0xff]  }
 0x116   :  { %3308 = vmatprep.subr.bf16.mxu0 %v5420_v50  ;;  %3636 = vmatprep.subr.bf16.mxu1 %v5423_v51  ;;  %v5510_v50 = vld [vmem:[#allocation5 + $0x724] ss:$16 sps:$4 sm:$0xff]   ;;  %v5513_v51 = vld [vmem:[#allocation5 + $0x72c] ss:$16 sps:$4 sm:$0xff]  }
 0x119   :  { %3309 = vmatpush1.bf16.msra.mxu0 %v5418_v52  ;;  %3637 = vmatpush1.bf16.msra.mxu1 %v5421_v53  ;;  %v5508_v52 = vld [vmem:[#allocation5 + $0x720] ss:$16 sps:$4 sm:$0xff]   ;;  %v5511_v53 = vld [vmem:[#allocation5 + $0x728] ss:$16 sps:$4 sm:$0xff]  }
 0x11a   :  { %3310 = vmatprep.subr.bf16.mxu0 %v5426_v54  ;;  %3638 = vmatprep.subr.bf16.mxu1 %v5429_v55  ;;  %v5516_v54 = vld [vmem:[#allocation5 + $0x744] ss:$16 sps:$4 sm:$0xff]   ;;  %v5519_v55 = vld [vmem:[#allocation5 + $0x74c] ss:$16 sps:$4 sm:$0xff]  }
 0x11d   :  { %3311 = vmatpush1.bf16.msra.mxu0 %v5424_v56  ;;  %3639 = vmatpush1.bf16.msra.mxu1 %v5427_v57  ;;  %v5514_v56 = vld [vmem:[#allocation5 + $0x740] ss:$16 sps:$4 sm:$0xff]   ;;  %v5517_v57 = vld [vmem:[#allocation5 + $0x748] ss:$16 sps:$4 sm:$0xff]  }
 0x11e   :  { %3312 = vmatprep.subr.bf16.mxu0 %v5432_v58  ;;  %3640 = vmatprep.subr.bf16.mxu1 %v5435_v59  ;;  %v5522_v58 = vld [vmem:[#allocation5 + $0x764] ss:$16 sps:$4 sm:$0xff]   ;;  %v5525_v59 = vld [vmem:[#allocation5 + $0x76c] ss:$16 sps:$4 sm:$0xff]  }
 0x121   :  { %3313 = vmatpush1.bf16.msra.mxu0 %v5430_v60  ;;  %3641 = vmatpush1.bf16.msra.mxu1 %v5433_v61  ;;  %v5520_v60 = vld [vmem:[#allocation5 + $0x760] ss:$16 sps:$4 sm:$0xff]   ;;  %v5523_v61 = vld [vmem:[#allocation5 + $0x768] ss:$16 sps:$4 sm:$0xff]  }
 0x122   :  { %3314 = vmatprep.subr.bf16.mxu0 %v5438_v62  ;;  %3642 = vmatprep.subr.bf16.mxu1 %v5441_v63  ;;  %v5528_v62 = vld [vmem:[#allocation5 + $0x784] ss:$16 sps:$4 sm:$0xff]   ;;  %v5531_v63 = vld [vmem:[#allocation5 + $0x78c] ss:$16 sps:$4 sm:$0xff]  }
 0x125   :  { %3315 = vmatpush1.bf16.msra.mxu0 %v5436_v0  ;;  %3643 = vmatpush1.bf16.msra.mxu1 %v5439_v1  ;;  %v5526_v0 = vld [vmem:[#allocation5 + $0x780] ss:$16 sps:$4 sm:$0xff]   ;;  %v5529_v1 = vld [vmem:[#allocation5 + $0x788] ss:$16 sps:$4 sm:$0xff]  }
 0x126   :  { %3316 = vmatprep.subr.bf16.mxu0 %v5444_v2  ;;  %3644 = vmatprep.subr.bf16.mxu1 %v5447_v3  ;;  %v5534_v2 = vld [vmem:[#allocation5 + $0x7a4] ss:$16 sps:$4 sm:$0xff]   ;;  %v5537_v3 = vld [vmem:[#allocation5 + $0x7ac] ss:$16 sps:$4 sm:$0xff]  }
 0x129   :  { %3317 = vmatpush1.bf16.msra.mxu0 %v5442_v4  ;;  %3645 = vmatpush1.bf16.msra.mxu1 %v5445_v5  ;;  %v5532_v4 = vld [vmem:[#allocation5 + $0x7a0] ss:$16 sps:$4 sm:$0xff]   ;;  %v5535_v5 = vld [vmem:[#allocation5 + $0x7a8] ss:$16 sps:$4 sm:$0xff]  }
 0x12a   :  { %3318 = vmatprep.subr.bf16.mxu0 %v5450_v6  ;;  %3646 = vmatprep.subr.bf16.mxu1 %v5453_v7  ;;  %v5540_v6 = vld [vmem:[#allocation5 + $0x7c4] ss:$16 sps:$4 sm:$0xff]   ;;  %v5543_v7 = vld [vmem:[#allocation5 + $0x7cc] ss:$16 sps:$4 sm:$0xff]  }
 0x12d   :  { %3319 = vmatpush1.bf16.msra.mxu0 %v5448_v8  ;;  %3647 = vmatpush1.bf16.msra.mxu1 %v5451_v9  ;;  %v5538_v8 = vld [vmem:[#allocation5 + $0x7c0] ss:$16 sps:$4 sm:$0xff]   ;;  %v5541_v9 = vld [vmem:[#allocation5 + $0x7c8] ss:$16 sps:$4 sm:$0xff]  }
 0x12e   :  { %3329 = vmatprep.subr.bf16.mxu0 %v5456_v10  ;;  %3657 = vmatprep.subr.bf16.mxu1 %v5459_v12  ;;  %v5546_v10 = vld [vmem:[#allocation5 + $0x7e4] ss:$16 sps:$4 sm:$0xff]   ;;  %v5544_v12 = vld [vmem:[#allocation5 + $0x7e0] ss:$16 sps:$4 sm:$0xff]  }
 0x130   :  { %3321 = vmatmul.mubr.bf16.vlgmr.msra.gmra.mrb[0].mxu0 %v122_v15  ;;  %3649 = vmatmul.mubr.bf16.vlgmr.msra.gmra.mrb[0].mxu1 %v122_v15  ;;  %v5552_v15 = vld [vmem:[#allocation5 + $0x804] ss:$16 sps:$4 sm:$0xff]  }
 0x131   :  { %3330 = vmatpush1.bf16.msra.mxu0 %v5454_v13  ;;  %3658 = vmatpush1.bf16.msra.mxu1 %v5457_v14  ;;  %v5547_v13 = vld [vmem:[#allocation5 + $0x7e8] ss:$16 sps:$4 sm:$0xff]   ;;  %v108_v14 = vld [vmem:[#allocation2 + $0x30] sm:$0xff] }
 0x132   :  { %3331 = vmatprep.subr.bf16.mxu0 %v5462_v17  ;;  %3659 = vmatprep.subr.bf16.mxu1 %v5465_v18  ;;  %v124_v17 = vpack.c.bf16 %v108_v14, %v108_v14  ;;  %v111_v18 = vld [vmem:[#allocation2 + $0x48] sm:$0xff]  ;;  %v5642_v14 = vld [vmem:[#allocation5 + $0x9e4] ss:$16 sps:$4 sm:$0xff]  }
 0x133   :  { %3361 = vmatprep.mubr.bf16.mxu0 %v125_v19  ;;  %3689 = vmatprep.mubr.bf16.mxu1 %v125_v19  ;;  %v5550_v19 = vld [vmem:[#allocation5 + $0x800] ss:$16 sps:$4 sm:$0xff]  }
 0x135   :  { %3332 = vmatpush1.bf16.msra.mxu0 %v5460_v20  ;;  %3660 = vmatpush1.bf16.msra.mxu1 %v5463_v21  ;;  %v5553_v20 = vld [vmem:[#allocation5 + $0x808] ss:$16 sps:$4 sm:$0xff]   ;;  %v5558_v21 = vld [vmem:[#allocation5 + $0x824] ss:$16 sps:$4 sm:$0xff]  }
 0x136   :  { %3333 = vmatprep.subr.bf16.mxu0 %v5468_v22  ;;  %3661 = vmatprep.subr.bf16.mxu1 %v5471_v23  ;;  %v5561_v22 = vld [vmem:[#allocation5 + $0x82c] ss:$16 sps:$4 sm:$0xff]   ;;  %v127_v23 = vpack.c.bf16 %v111_v18, %v111_v18  ;;  %v5648_v18 = vld [vmem:[#allocation5 + $0xa04] ss:$16 sps:$4 sm:$0xff]  }
 0x139   :  { %3334 = vmatpush1.bf16.msra.mxu0 %v5466_v24  ;;  %3662 = vmatpush1.bf16.msra.mxu1 %v5469_v25  ;;  %v5556_v24 = vld [vmem:[#allocation5 + $0x820] ss:$16 sps:$4 sm:$0xff]   ;;  %v5559_v25 = vld [vmem:[#allocation5 + $0x828] ss:$16 sps:$4 sm:$0xff]  }
 0x13a   :  { %3335 = vmatprep.subr.bf16.mxu0 %v5474_v26  ;;  %3663 = vmatprep.subr.bf16.mxu1 %v5477_v27  ;;  %v5564_v26 = vld [vmem:[#allocation5 + $0x844] ss:$16 sps:$4 sm:$0xff]   ;;  %v5567_v27 = vld [vmem:[#allocation5 + $0x84c] ss:$16 sps:$4 sm:$0xff]  }
 0x13d   :  { %3336 = vmatpush1.bf16.msra.mxu0 %v5472_v28  ;;  %3664 = vmatpush1.bf16.msra.mxu1 %v5475_v29  ;;  %v5562_v28 = vld [vmem:[#allocation5 + $0x840] ss:$16 sps:$4 sm:$0xff]   ;;  %v5565_v29 = vld [vmem:[#allocation5 + $0x848] ss:$16 sps:$4 sm:$0xff]  }
 0x13e   :  { %3337 = vmatprep.subr.bf16.mxu0 %v5480_v30  ;;  %3665 = vmatprep.subr.bf16.mxu1 %v5483_v31  ;;  %v5570_v30 = vld [vmem:[#allocation5 + $0x864] ss:$16 sps:$4 sm:$0xff]   ;;  %v5573_v31 = vld [vmem:[#allocation5 + $0x86c] ss:$16 sps:$4 sm:$0xff]  }
 0x141   :  { %3338 = vmatpush1.bf16.msra.mxu0 %v5478_v32  ;;  %3666 = vmatpush1.bf16.msra.mxu1 %v5481_v33  ;;  %v5568_v32 = vld [vmem:[#allocation5 + $0x860] ss:$16 sps:$4 sm:$0xff]   ;;  %v5571_v33 = vld [vmem:[#allocation5 + $0x868] ss:$16 sps:$4 sm:$0xff]  }
 0x142   :  { %3339 = vmatprep.subr.bf16.mxu0 %v5486_v34  ;;  %3667 = vmatprep.subr.bf16.mxu1 %v5489_v35  ;;  %v5576_v34 = vld [vmem:[#allocation5 + $0x884] ss:$16 sps:$4 sm:$0xff]   ;;  %v5579_v35 = vld [vmem:[#allocation5 + $0x88c] ss:$16 sps:$4 sm:$0xff]  }
 0x145   :  { %3340 = vmatpush1.bf16.msra.mxu0 %v5484_v36  ;;  %3668 = vmatpush1.bf16.msra.mxu1 %v5487_v37  ;;  %v5574_v36 = vld [vmem:[#allocation5 + $0x880] ss:$16 sps:$4 sm:$0xff]   ;;  %v5577_v37 = vld [vmem:[#allocation5 + $0x888] ss:$16 sps:$4 sm:$0xff]  }
 0x146   :  { %3341 = vmatprep.subr.bf16.mxu0 %v5492_v38  ;;  %3669 = vmatprep.subr.bf16.mxu1 %v5495_v39  ;;  %v5582_v38 = vld [vmem:[#allocation5 + $0x8a4] ss:$16 sps:$4 sm:$0xff]   ;;  %v5585_v39 = vld [vmem:[#allocation5 + $0x8ac] ss:$16 sps:$4 sm:$0xff]  }
 0x149   :  { %3342 = vmatpush1.bf16.msra.mxu0 %v5490_v40  ;;  %3670 = vmatpush1.bf16.msra.mxu1 %v5493_v41  ;;  %v5580_v40 = vld [vmem:[#allocation5 + $0x8a0] ss:$16 sps:$4 sm:$0xff]   ;;  %v5583_v41 = vld [vmem:[#allocation5 + $0x8a8] ss:$16 sps:$4 sm:$0xff]  }
 0x14a   :  { %3343 = vmatprep.subr.bf16.mxu0 %v5498_v42  ;;  %3671 = vmatprep.subr.bf16.mxu1 %v5501_v43  ;;  %v5588_v42 = vld [vmem:[#allocation5 + $0x8c4] ss:$16 sps:$4 sm:$0xff]   ;;  %v5591_v43 = vld [vmem:[#allocation5 + $0x8cc] ss:$16 sps:$4 sm:$0xff]  }
 0x14d   :  { %3344 = vmatpush1.bf16.msra.mxu0 %v5496_v44  ;;  %3672 = vmatpush1.bf16.msra.mxu1 %v5499_v45  ;;  %v5586_v44 = vld [vmem:[#allocation5 + $0x8c0] ss:$16 sps:$4 sm:$0xff]   ;;  %v5589_v45 = vld [vmem:[#allocation5 + $0x8c8] ss:$16 sps:$4 sm:$0xff]  }
 0x14e   :  { %3345 = vmatprep.subr.bf16.mxu0 %v5504_v46  ;;  %3673 = vmatprep.subr.bf16.mxu1 %v5507_v47  ;;  %v5594_v46 = vld [vmem:[#allocation5 + $0x8e4] ss:$16 sps:$4 sm:$0xff]   ;;  %v5597_v47 = vld [vmem:[#allocation5 + $0x8ec] ss:$16 sps:$4 sm:$0xff]  }
 0x151   :  { %3346 = vmatpush1.bf16.msra.mxu0 %v5502_v48  ;;  %3674 = vmatpush1.bf16.msra.mxu1 %v5505_v49  ;;  %v5592_v48 = vld [vmem:[#allocation5 + $0x8e0] ss:$16 sps:$4 sm:$0xff]   ;;  %v5595_v49 = vld [vmem:[#allocation5 + $0x8e8] ss:$16 sps:$4 sm:$0xff]  }
 0x152   :  { %3347 = vmatprep.subr.bf16.mxu0 %v5510_v50  ;;  %3675 = vmatprep.subr.bf16.mxu1 %v5513_v51  ;;  %v5600_v50 = vld [vmem:[#allocation5 + $0x904] ss:$16 sps:$4 sm:$0xff]   ;;  %v5603_v51 = vld [vmem:[#allocation5 + $0x90c] ss:$16 sps:$4 sm:$0xff]  }
 0x155   :  { %3348 = vmatpush1.bf16.msra.mxu0 %v5508_v52  ;;  %3676 = vmatpush1.bf16.msra.mxu1 %v5511_v53  ;;  %v5598_v52 = vld [vmem:[#allocation5 + $0x900] ss:$16 sps:$4 sm:$0xff]   ;;  %v5601_v53 = vld [vmem:[#allocation5 + $0x908] ss:$16 sps:$4 sm:$0xff]  }
 0x156   :  { %3349 = vmatprep.subr.bf16.mxu0 %v5516_v54  ;;  %3677 = vmatprep.subr.bf16.mxu1 %v5519_v55  ;;  %v5606_v54 = vld [vmem:[#allocation5 + $0x924] ss:$16 sps:$4 sm:$0xff]   ;;  %v5609_v55 = vld [vmem:[#allocation5 + $0x92c] ss:$16 sps:$4 sm:$0xff]  }
 0x159   :  { %3350 = vmatpush1.bf16.msra.mxu0 %v5514_v56  ;;  %3678 = vmatpush1.bf16.msra.mxu1 %v5517_v57  ;;  %v5604_v56 = vld [vmem:[#allocation5 + $0x920] ss:$16 sps:$4 sm:$0xff]   ;;  %v5607_v57 = vld [vmem:[#allocation5 + $0x928] ss:$16 sps:$4 sm:$0xff]  }
 0x15a   :  { %3351 = vmatprep.subr.bf16.mxu0 %v5522_v58  ;;  %3679 = vmatprep.subr.bf16.mxu1 %v5525_v59  ;;  %v5612_v58 = vld [vmem:[#allocation5 + $0x944] ss:$16 sps:$4 sm:$0xff]   ;;  %v5615_v59 = vld [vmem:[#allocation5 + $0x94c] ss:$16 sps:$4 sm:$0xff]  }
 0x15d   :  { %3352 = vmatpush1.bf16.msra.mxu0 %v5520_v60  ;;  %3680 = vmatpush1.bf16.msra.mxu1 %v5523_v61  ;;  %v5610_v60 = vld [vmem:[#allocation5 + $0x940] ss:$16 sps:$4 sm:$0xff]   ;;  %v5613_v61 = vld [vmem:[#allocation5 + $0x948] ss:$16 sps:$4 sm:$0xff]  }
 0x15e   :  { %3353 = vmatprep.subr.bf16.mxu0 %v5528_v62  ;;  %3681 = vmatprep.subr.bf16.mxu1 %v5531_v63  ;;  %v5618_v62 = vld [vmem:[#allocation5 + $0x964] ss:$16 sps:$4 sm:$0xff]   ;;  %v5621_v63 = vld [vmem:[#allocation5 + $0x96c] ss:$16 sps:$4 sm:$0xff]  }
 0x161   :  { %3354 = vmatpush1.bf16.msra.mxu0 %v5526_v0  ;;  %3682 = vmatpush1.bf16.msra.mxu1 %v5529_v1  ;;  %v5616_v0 = vld [vmem:[#allocation5 + $0x960] ss:$16 sps:$4 sm:$0xff]   ;;  %v5619_v1 = vld [vmem:[#allocation5 + $0x968] ss:$16 sps:$4 sm:$0xff]  }
 0x162   :  { %3355 = vmatprep.subr.bf16.mxu0 %v5534_v2  ;;  %3683 = vmatprep.subr.bf16.mxu1 %v5537_v3  ;;  %v5624_v2 = vld [vmem:[#allocation5 + $0x984] ss:$16 sps:$4 sm:$0xff]   ;;  %v5627_v3 = vld [vmem:[#allocation5 + $0x98c] ss:$16 sps:$4 sm:$0xff]  }
 0x165   :  { %3356 = vmatpush1.bf16.msra.mxu0 %v5532_v4  ;;  %3684 = vmatpush1.bf16.msra.mxu1 %v5535_v5  ;;  %v5622_v4 = vld [vmem:[#allocation5 + $0x980] ss:$16 sps:$4 sm:$0xff]   ;;  %v5625_v5 = vld [vmem:[#allocation5 + $0x988] ss:$16 sps:$4 sm:$0xff]  }
 0x166   :  { %3357 = vmatprep.subr.bf16.mxu0 %v5540_v6  ;;  %3685 = vmatprep.subr.bf16.mxu1 %v5543_v7  ;;  %v5630_v6 = vld [vmem:[#allocation5 + $0x9a4] ss:$16 sps:$4 sm:$0xff]   ;;  %v5633_v7 = vld [vmem:[#allocation5 + $0x9ac] ss:$16 sps:$4 sm:$0xff]  }
 0x169   :  { %3358 = vmatpush1.bf16.msra.mxu0 %v5538_v8  ;;  %3686 = vmatpush1.bf16.msra.mxu1 %v5541_v9  ;;  %v5628_v8 = vld [vmem:[#allocation5 + $0x9a0] ss:$16 sps:$4 sm:$0xff]   ;;  %v5631_v9 = vld [vmem:[#allocation5 + $0x9a8] ss:$16 sps:$4 sm:$0xff]  }
 0x16a   :  { %3359 = vmatprep.subr.bf16.mxu0 %v5546_v10  ;;  %3687 = vmatprep.subr.bf16.mxu1 %v5549_v11  ;;  %v5636_v10 = vld [vmem:[#allocation5 + $0x9c4] ss:$16 sps:$4 sm:$0xff]   ;;  %v5639_v11 = vld [vmem:[#allocation5 + $0x9cc] ss:$16 sps:$4 sm:$0xff]  }
 0x16d   :  { %3360 = vmatpush1.bf16.msra.mxu0 %v5544_v12  ;;  %3688 = vmatpush1.bf16.msra.mxu1 %v5547_v13  ;;  %v5634_v12 = vld [vmem:[#allocation5 + $0x9c0] ss:$16 sps:$4 sm:$0xff]   ;;  %v5637_v13 = vld [vmem:[#allocation5 + $0x9c8] ss:$16 sps:$4 sm:$0xff]  }
 0x16e   :  { %3370 = vmatprep.subr.bf16.mxu0 %v5552_v15  ;;  %3698 = vmatprep.subr.bf16.mxu1 %v5555_v16  ;;  %v5645_v15 = vld [vmem:[#allocation5 + $0x9ec] ss:$16 sps:$4 sm:$0xff]   ;;  %v5640_v16 = vld [vmem:[#allocation5 + $0x9e0] ss:$16 sps:$4 sm:$0xff]  }
 0x170   :  { %3362 = vmatmul.mubr.bf16.vlgmr.msra.gmra.mrb[0].mxu0 %v124_v17  ;;  %3690 = vmatmul.mubr.bf16.vlgmr.msra.gmra.mrb[0].mxu1 %v124_v17  ;;  %v5643_v17 = vld [vmem:[#allocation5 + $0x9e8] ss:$16 sps:$4 sm:$0xff]  }
 0x171   :  { %3371 = vmatpush1.bf16.msra.mxu0 %v5550_v19  ;;  %3699 = vmatpush1.bf16.msra.mxu1 %v5553_v20  ;;  %v110_v19 = vld [vmem:[#allocation2 + $0x40] sm:$0xff]  ;;  %v5651_v20 = vld [vmem:[#allocation5 + $0xa0c] ss:$16 sps:$4 sm:$0xff]  }
 0x172   :  { %3372 = vmatprep.subr.bf16.mxu0 %v5558_v21  ;;  %3700 = vmatprep.subr.bf16.mxu1 %v5561_v22  ;;  %v113_v21 = vld [vmem:[#allocation2 + $0x58] sm:$0xff]  ;;  %v126_v22 = vpack.c.bf16 %v110_v19, %v110_v19 }
 0x173   :  { %3402 = vmatprep.mubr.bf16.mxu0 %v127_v23  ;;  %3730 = vmatprep.mubr.bf16.mxu1 %v127_v23  ;;  %v5646_v23 = vld [vmem:[#allocation5 + $0xa00] ss:$16 sps:$4 sm:$0xff]   ;;  %v5741_v19 = vld [vmem:[#allocation5 + $0xbec] ss:$16 sps:$4 sm:$0xff]  }
 0x175   :  { %3373 = vmatpush1.bf16.msra.mxu0 %v5556_v24  ;;  %3701 = vmatpush1.bf16.msra.mxu1 %v5559_v25  ;;  %v5649_v24 = vld [vmem:[#allocation5 + $0xa08] ss:$16 sps:$4 sm:$0xff]   ;;  %v5654_v25 = vld [vmem:[#allocation5 + $0xa24] ss:$16 sps:$4 sm:$0xff]  }
 0x176   :  { %3374 = vmatprep.subr.bf16.mxu0 %v5564_v26  ;;  %3702 = vmatprep.subr.bf16.mxu1 %v5567_v27  ;;  %v5657_v26 = vld [vmem:[#allocation5 + $0xa2c] ss:$16 sps:$4 sm:$0xff]   ;;  %v129_v27 = vpack.c.bf16 %v113_v21, %v113_v21  ;;  %v5739_v21 = vld [vmem:[#allocation5 + $0xbe8] ss:$16 sps:$4 sm:$0xff]  }
 0x179   :  { %3375 = vmatpush1.bf16.msra.mxu0 %v5562_v28  ;;  %3703 = vmatpush1.bf16.msra.mxu1 %v5565_v29  ;;  %v5652_v28 = vld [vmem:[#allocation5 + $0xa20] ss:$16 sps:$4 sm:$0xff]   ;;  %v5655_v29 = vld [vmem:[#allocation5 + $0xa28] ss:$16 sps:$4 sm:$0xff]  }
 0x17a   :  { %3376 = vmatprep.subr.bf16.mxu0 %v5570_v30  ;;  %3704 = vmatprep.subr.bf16.mxu1 %v5573_v31  ;;  %v5660_v30 = vld [vmem:[#allocation5 + $0xa44] ss:$16 sps:$4 sm:$0xff]   ;;  %v5663_v31 = vld [vmem:[#allocation5 + $0xa4c] ss:$16 sps:$4 sm:$0xff]  }
 0x17d   :  { %3377 = vmatpush1.bf16.msra.mxu0 %v5568_v32  ;;  %3705 = vmatpush1.bf16.msra.mxu1 %v5571_v33  ;;  %v5658_v32 = vld [vmem:[#allocation5 + $0xa40] ss:$16 sps:$4 sm:$0xff]   ;;  %v5661_v33 = vld [vmem:[#allocation5 + $0xa48] ss:$16 sps:$4 sm:$0xff]  }
 0x17e   :  { %3378 = vmatprep.subr.bf16.mxu0 %v5576_v34  ;;  %3706 = vmatprep.subr.bf16.mxu1 %v5579_v35  ;;  %v5666_v34 = vld [vmem:[#allocation5 + $0xa64] ss:$16 sps:$4 sm:$0xff]   ;;  %v5669_v35 = vld [vmem:[#allocation5 + $0xa6c] ss:$16 sps:$4 sm:$0xff]  }
 0x181   :  { %3379 = vmatpush1.bf16.msra.mxu0 %v5574_v36  ;;  %3707 = vmatpush1.bf16.msra.mxu1 %v5577_v37  ;;  %v5664_v36 = vld [vmem:[#allocation5 + $0xa60] ss:$16 sps:$4 sm:$0xff]   ;;  %v5667_v37 = vld [vmem:[#allocation5 + $0xa68] ss:$16 sps:$4 sm:$0xff]  }
 0x182   :  { %3380 = vmatprep.subr.bf16.mxu0 %v5582_v38  ;;  %3708 = vmatprep.subr.bf16.mxu1 %v5585_v39  ;;  %v5672_v38 = vld [vmem:[#allocation5 + $0xa84] ss:$16 sps:$4 sm:$0xff]   ;;  %v5675_v39 = vld [vmem:[#allocation5 + $0xa8c] ss:$16 sps:$4 sm:$0xff]  }
 0x185   :  { %3381 = vmatpush1.bf16.msra.mxu0 %v5580_v40  ;;  %3709 = vmatpush1.bf16.msra.mxu1 %v5583_v41  ;;  %v5670_v40 = vld [vmem:[#allocation5 + $0xa80] ss:$16 sps:$4 sm:$0xff]   ;;  %v5673_v41 = vld [vmem:[#allocation5 + $0xa88] ss:$16 sps:$4 sm:$0xff]  }
 0x186   :  { %3382 = vmatprep.subr.bf16.mxu0 %v5588_v42  ;;  %3710 = vmatprep.subr.bf16.mxu1 %v5591_v43  ;;  %v5678_v42 = vld [vmem:[#allocation5 + $0xaa4] ss:$16 sps:$4 sm:$0xff]   ;;  %v5681_v43 = vld [vmem:[#allocation5 + $0xaac] ss:$16 sps:$4 sm:$0xff]  }
 0x189   :  { %3383 = vmatpush1.bf16.msra.mxu0 %v5586_v44  ;;  %3711 = vmatpush1.bf16.msra.mxu1 %v5589_v45  ;;  %v5676_v44 = vld [vmem:[#allocation5 + $0xaa0] ss:$16 sps:$4 sm:$0xff]   ;;  %v5679_v45 = vld [vmem:[#allocation5 + $0xaa8] ss:$16 sps:$4 sm:$0xff]  }
 0x18a   :  { %3384 = vmatprep.subr.bf16.mxu0 %v5594_v46  ;;  %3712 = vmatprep.subr.bf16.mxu1 %v5597_v47  ;;  %v5684_v46 = vld [vmem:[#allocation5 + $0xac4] ss:$16 sps:$4 sm:$0xff]   ;;  %v5687_v47 = vld [vmem:[#allocation5 + $0xacc] ss:$16 sps:$4 sm:$0xff]  }
 0x18d   :  { %3385 = vmatpush1.bf16.msra.mxu0 %v5592_v48  ;;  %3713 = vmatpush1.bf16.msra.mxu1 %v5595_v49  ;;  %v5682_v48 = vld [vmem:[#allocation5 + $0xac0] ss:$16 sps:$4 sm:$0xff]   ;;  %v5685_v49 = vld [vmem:[#allocation5 + $0xac8] ss:$16 sps:$4 sm:$0xff]  }
 0x18e   :  { %3386 = vmatprep.subr.bf16.mxu0 %v5600_v50  ;;  %3714 = vmatprep.subr.bf16.mxu1 %v5603_v51  ;;  %v5690_v50 = vld [vmem:[#allocation5 + $0xae4] ss:$16 sps:$4 sm:$0xff]   ;;  %v5693_v51 = vld [vmem:[#allocation5 + $0xaec] ss:$16 sps:$4 sm:$0xff]  }
 0x191   :  { %3387 = vmatpush1.bf16.msra.mxu0 %v5598_v52  ;;  %3715 = vmatpush1.bf16.msra.mxu1 %v5601_v53  ;;  %v5688_v52 = vld [vmem:[#allocation5 + $0xae0] ss:$16 sps:$4 sm:$0xff]   ;;  %v5691_v53 = vld [vmem:[#allocation5 + $0xae8] ss:$16 sps:$4 sm:$0xff]  }
 0x192   :  { %3388 = vmatprep.subr.bf16.mxu0 %v5606_v54  ;;  %3716 = vmatprep.subr.bf16.mxu1 %v5609_v55  ;;  %v5696_v54 = vld [vmem:[#allocation5 + $0xb04] ss:$16 sps:$4 sm:$0xff]   ;;  %v5699_v55 = vld [vmem:[#allocation5 + $0xb0c] ss:$16 sps:$4 sm:$0xff]  }
 0x195   :  { %3389 = vmatpush1.bf16.msra.mxu0 %v5604_v56  ;;  %3717 = vmatpush1.bf16.msra.mxu1 %v5607_v57  ;;  %v5694_v56 = vld [vmem:[#allocation5 + $0xb00] ss:$16 sps:$4 sm:$0xff]   ;;  %v5697_v57 = vld [vmem:[#allocation5 + $0xb08] ss:$16 sps:$4 sm:$0xff]  }
 0x196   :  { %3390 = vmatprep.subr.bf16.mxu0 %v5612_v58  ;;  %3718 = vmatprep.subr.bf16.mxu1 %v5615_v59  ;;  %v5702_v58 = vld [vmem:[#allocation5 + $0xb24] ss:$16 sps:$4 sm:$0xff]   ;;  %v5705_v59 = vld [vmem:[#allocation5 + $0xb2c] ss:$16 sps:$4 sm:$0xff]  }
 0x199   :  { %3391 = vmatpush1.bf16.msra.mxu0 %v5610_v60  ;;  %3719 = vmatpush1.bf16.msra.mxu1 %v5613_v61  ;;  %v5700_v60 = vld [vmem:[#allocation5 + $0xb20] ss:$16 sps:$4 sm:$0xff]   ;;  %v5703_v61 = vld [vmem:[#allocation5 + $0xb28] ss:$16 sps:$4 sm:$0xff]  }
 0x19a   :  { %3392 = vmatprep.subr.bf16.mxu0 %v5618_v62  ;;  %3720 = vmatprep.subr.bf16.mxu1 %v5621_v63  ;;  %v5708_v62 = vld [vmem:[#allocation5 + $0xb44] ss:$16 sps:$4 sm:$0xff]   ;;  %v5711_v63 = vld [vmem:[#allocation5 + $0xb4c] ss:$16 sps:$4 sm:$0xff]  }
 0x19d   :  { %3393 = vmatpush1.bf16.msra.mxu0 %v5616_v0  ;;  %3721 = vmatpush1.bf16.msra.mxu1 %v5619_v1  ;;  %v5706_v0 = vld [vmem:[#allocation5 + $0xb40] ss:$16 sps:$4 sm:$0xff]   ;;  %v5709_v1 = vld [vmem:[#allocation5 + $0xb48] ss:$16 sps:$4 sm:$0xff]  }
 0x19e   :  { %3394 = vmatprep.subr.bf16.mxu0 %v5624_v2  ;;  %3722 = vmatprep.subr.bf16.mxu1 %v5627_v3  ;;  %v5714_v2 = vld [vmem:[#allocation5 + $0xb64] ss:$16 sps:$4 sm:$0xff]   ;;  %v5717_v3 = vld [vmem:[#allocation5 + $0xb6c] ss:$16 sps:$4 sm:$0xff]  }
 0x1a1   :  { %3395 = vmatpush1.bf16.msra.mxu0 %v5622_v4  ;;  %3723 = vmatpush1.bf16.msra.mxu1 %v5625_v5  ;;  %v5712_v4 = vld [vmem:[#allocation5 + $0xb60] ss:$16 sps:$4 sm:$0xff]   ;;  %v5715_v5 = vld [vmem:[#allocation5 + $0xb68] ss:$16 sps:$4 sm:$0xff]  }
 0x1a2   :  { %3396 = vmatprep.subr.bf16.mxu0 %v5630_v6  ;;  %3724 = vmatprep.subr.bf16.mxu1 %v5633_v7  ;;  %v5720_v6 = vld [vmem:[#allocation5 + $0xb84] ss:$16 sps:$4 sm:$0xff]   ;;  %v5723_v7 = vld [vmem:[#allocation5 + $0xb8c] ss:$16 sps:$4 sm:$0xff]  }
 0x1a5   :  { %3397 = vmatpush1.bf16.msra.mxu0 %v5628_v8  ;;  %3725 = vmatpush1.bf16.msra.mxu1 %v5631_v9  ;;  %v5718_v8 = vld [vmem:[#allocation5 + $0xb80] ss:$16 sps:$4 sm:$0xff]   ;;  %v5721_v9 = vld [vmem:[#allocation5 + $0xb88] ss:$16 sps:$4 sm:$0xff]  }
 0x1a6   :  { %3398 = vmatprep.subr.bf16.mxu0 %v5636_v10  ;;  %3726 = vmatprep.subr.bf16.mxu1 %v5639_v11  ;;  %v5726_v10 = vld [vmem:[#allocation5 + $0xba4] ss:$16 sps:$4 sm:$0xff]   ;;  %v5729_v11 = vld [vmem:[#allocation5 + $0xbac] ss:$16 sps:$4 sm:$0xff]  }
 0x1a9   :  { %3399 = vmatpush1.bf16.msra.mxu0 %v5634_v12  ;;  %3727 = vmatpush1.bf16.msra.mxu1 %v5637_v13  ;;  %v5724_v12 = vld [vmem:[#allocation5 + $0xba0] ss:$16 sps:$4 sm:$0xff]   ;;  %v5727_v13 = vld [vmem:[#allocation5 + $0xba8] ss:$16 sps:$4 sm:$0xff]  }
 0x1aa   :  { %3400 = vmatprep.subr.bf16.mxu0 %v5642_v14  ;;  %3728 = vmatprep.subr.bf16.mxu1 %v5645_v15  ;;  %v5732_v14 = vld [vmem:[#allocation5 + $0xbc4] ss:$16 sps:$4 sm:$0xff]   ;;  %v5735_v15 = vld [vmem:[#allocation5 + $0xbcc] ss:$16 sps:$4 sm:$0xff]  }
 0x1ad   :  { %3401 = vmatpush1.bf16.msra.mxu0 %v5640_v16  ;;  %3729 = vmatpush1.bf16.msra.mxu1 %v5643_v17  ;;  %v5730_v16 = vld [vmem:[#allocation5 + $0xbc0] ss:$16 sps:$4 sm:$0xff]   ;;  %v5733_v17 = vld [vmem:[#allocation5 + $0xbc8] ss:$16 sps:$4 sm:$0xff]  }
 0x1ae   :  { %3411 = vmatprep.subr.bf16.mxu0 %v5648_v18  ;;  %3739 = vmatprep.subr.bf16.mxu1 %v5651_v20  ;;  %v5738_v18 = vld [vmem:[#allocation5 + $0xbe4] ss:$16 sps:$4 sm:$0xff]   ;;  %v5736_v20 = vld [vmem:[#allocation5 + $0xbe0] ss:$16 sps:$4 sm:$0xff]  }
 0x1b0   :  { %3403 = vmatmul.mubr.bf16.vlgmr.msra.gmra.mrb[0].mxu0 %v126_v22  ;;  %3731 = vmatmul.mubr.bf16.vlgmr.msra.gmra.mrb[0].mxu1 %v126_v22  ;;  %v6304_v22 = vld [vmem:[#allocation2 + $0x50] sm:$0xff] }
 0x1b1   :  { %3412 = vmatpush1.bf16.msra.mxu0 %v5646_v23  ;;  %3740 = vmatpush1.bf16.msra.mxu1 %v5649_v24  ;;  %v5744_v23 = vld [vmem:[#allocation5 + $0xc04] ss:$16 sps:$4 sm:$0xff]   ;;  %v5747_v24 = vld [vmem:[#allocation5 + $0xc0c] ss:$16 sps:$4 sm:$0xff]  }
 0x1b2   :  { %3413 = vmatprep.subr.bf16.mxu0 %v5654_v25  ;;  %3741 = vmatprep.subr.bf16.mxu1 %v5657_v26  ;;  %v128_v25 = vpack.c.bf16 %v6304_v22, %v6304_v22  ;;  %v6308_v26 = vld [vmem:[#allocation2 + $0x68] sm:$0xff] }
 0x1b3   :  { %3443 = vmatprep.mubr.bf16.mxu0 %v129_v27  ;;  %3771 = vmatprep.mubr.bf16.mxu1 %v129_v27  ;;  %v5742_v27 = vld [vmem:[#allocation5 + $0xc00] ss:$16 sps:$4 sm:$0xff]  }
 0x1b5   :  { %3414 = vmatpush1.bf16.msra.mxu0 %v5652_v28  ;;  %3742 = vmatpush1.bf16.msra.mxu1 %v5655_v29  ;;  %v5745_v28 = vld [vmem:[#allocation5 + $0xc08] ss:$16 sps:$4 sm:$0xff]   ;;  %v5750_v29 = vld [vmem:[#allocation5 + $0xc24] ss:$16 sps:$4 sm:$0xff]  }
 0x1b6   :  { %3415 = vmatprep.subr.bf16.mxu0 %v5660_v30  ;;  %3743 = vmatprep.subr.bf16.mxu1 %v5663_v31  ;;  %v5753_v30 = vld [vmem:[#allocation5 + $0xc2c] ss:$16 sps:$4 sm:$0xff]   ;;  %v131_v31 = vpack.c.bf16 %v6308_v26, %v6308_v26 }
 0x1b9   :  { %3416 = vmatpush1.bf16.msra.mxu0 %v5658_v32  ;;  %3744 = vmatpush1.bf16.msra.mxu1 %v5661_v33  ;;  %v5748_v32 = vld [vmem:[#allocation5 + $0xc20] ss:$16 sps:$4 sm:$0xff]   ;;  %v5751_v33 = vld [vmem:[#allocation5 + $0xc28] ss:$16 sps:$4 sm:$0xff]  }
 0x1ba   :  { %3417 = vmatprep.subr.bf16.mxu0 %v5666_v34  ;;  %3745 = vmatprep.subr.bf16.mxu1 %v5669_v35  ;;  %v5756_v34 = vld [vmem:[#allocation5 + $0xc44] ss:$16 sps:$4 sm:$0xff]   ;;  %v5759_v35 = vld [vmem:[#allocation5 + $0xc4c] ss:$16 sps:$4 sm:$0xff]  }
 0x1bd   :  { %3418 = vmatpush1.bf16.msra.mxu0 %v5664_v36  ;;  %3746 = vmatpush1.bf16.msra.mxu1 %v5667_v37  ;;  %v5754_v36 = vld [vmem:[#allocation5 + $0xc40] ss:$16 sps:$4 sm:$0xff]   ;;  %v5757_v37 = vld [vmem:[#allocation5 + $0xc48] ss:$16 sps:$4 sm:$0xff]  }
 0x1be   :  { %3419 = vmatprep.subr.bf16.mxu0 %v5672_v38  ;;  %3747 = vmatprep.subr.bf16.mxu1 %v5675_v39  ;;  %v5762_v38 = vld [vmem:[#allocation5 + $0xc64] ss:$16 sps:$4 sm:$0xff]   ;;  %v5765_v39 = vld [vmem:[#allocation5 + $0xc6c] ss:$16 sps:$4 sm:$0xff]  }
 0x1c1   :  { %3420 = vmatpush1.bf16.msra.mxu0 %v5670_v40  ;;  %3748 = vmatpush1.bf16.msra.mxu1 %v5673_v41  ;;  %v5760_v40 = vld [vmem:[#allocation5 + $0xc60] ss:$16 sps:$4 sm:$0xff]   ;;  %v5763_v41 = vld [vmem:[#allocation5 + $0xc68] ss:$16 sps:$4 sm:$0xff]  }
 0x1c2   :  { %3421 = vmatprep.subr.bf16.mxu0 %v5678_v42  ;;  %3749 = vmatprep.subr.bf16.mxu1 %v5681_v43  ;;  %v5768_v42 = vld [vmem:[#allocation5 + $0xc84] ss:$16 sps:$4 sm:$0xff]   ;;  %v5771_v43 = vld [vmem:[#allocation5 + $0xc8c] ss:$16 sps:$4 sm:$0xff]  }
 0x1c5   :  { %3422 = vmatpush1.bf16.msra.mxu0 %v5676_v44  ;;  %3750 = vmatpush1.bf16.msra.mxu1 %v5679_v45  ;;  %v5766_v44 = vld [vmem:[#allocation5 + $0xc80] ss:$16 sps:$4 sm:$0xff]   ;;  %v5769_v45 = vld [vmem:[#allocation5 + $0xc88] ss:$16 sps:$4 sm:$0xff]  }
 0x1c6   :  { %3423 = vmatprep.subr.bf16.mxu0 %v5684_v46  ;;  %3751 = vmatprep.subr.bf16.mxu1 %v5687_v47  ;;  %v5774_v46 = vld [vmem:[#allocation5 + $0xca4] ss:$16 sps:$4 sm:$0xff]   ;;  %v5777_v47 = vld [vmem:[#allocation5 + $0xcac] ss:$16 sps:$4 sm:$0xff]  }
 0x1c9   :  { %3424 = vmatpush1.bf16.msra.mxu0 %v5682_v48  ;;  %3752 = vmatpush1.bf16.msra.mxu1 %v5685_v49  ;;  %v5772_v48 = vld [vmem:[#allocation5 + $0xca0] ss:$16 sps:$4 sm:$0xff]   ;;  %v5775_v49 = vld [vmem:[#allocation5 + $0xca8] ss:$16 sps:$4 sm:$0xff]  }
 0x1ca   :  { %3425 = vmatprep.subr.bf16.mxu0 %v5690_v50  ;;  %3753 = vmatprep.subr.bf16.mxu1 %v5693_v51  ;;  %v5780_v50 = vld [vmem:[#allocation5 + $0xcc4] ss:$16 sps:$4 sm:$0xff]   ;;  %v5783_v51 = vld [vmem:[#allocation5 + $0xccc] ss:$16 sps:$4 sm:$0xff]  }
 0x1cd   :  { %3426 = vmatpush1.bf16.msra.mxu0 %v5688_v52  ;;  %3754 = vmatpush1.bf16.msra.mxu1 %v5691_v53  ;;  %v5778_v52 = vld [vmem:[#allocation5 + $0xcc0] ss:$16 sps:$4 sm:$0xff]   ;;  %v5781_v53 = vld [vmem:[#allocation5 + $0xcc8] ss:$16 sps:$4 sm:$0xff]  }
 0x1ce   :  { %3427 = vmatprep.subr.bf16.mxu0 %v5696_v54  ;;  %3755 = vmatprep.subr.bf16.mxu1 %v5699_v55  ;;  %v5786_v54 = vld [vmem:[#allocation5 + $0xce4] ss:$16 sps:$4 sm:$0xff]   ;;  %v5789_v55 = vld [vmem:[#allocation5 + $0xcec] ss:$16 sps:$4 sm:$0xff]  }
 0x1d1   :  { %3428 = vmatpush1.bf16.msra.mxu0 %v5694_v56  ;;  %3756 = vmatpush1.bf16.msra.mxu1 %v5697_v57  ;;  %v5784_v56 = vld [vmem:[#allocation5 + $0xce0] ss:$16 sps:$4 sm:$0xff]   ;;  %v5787_v57 = vld [vmem:[#allocation5 + $0xce8] ss:$16 sps:$4 sm:$0xff]  }
 0x1d2   :  { %3429 = vmatprep.subr.bf16.mxu0 %v5702_v58  ;;  %3757 = vmatprep.subr.bf16.mxu1 %v5705_v59  ;;  %v5792_v58 = vld [vmem:[#allocation5 + $0xd04] ss:$16 sps:$4 sm:$0xff]   ;;  %v5795_v59 = vld [vmem:[#allocation5 + $0xd0c] ss:$16 sps:$4 sm:$0xff]  }
 0x1d5   :  { %3430 = vmatpush1.bf16.msra.mxu0 %v5700_v60  ;;  %3758 = vmatpush1.bf16.msra.mxu1 %v5703_v61  ;;  %v5790_v60 = vld [vmem:[#allocation5 + $0xd00] ss:$16 sps:$4 sm:$0xff]   ;;  %v5793_v61 = vld [vmem:[#allocation5 + $0xd08] ss:$16 sps:$4 sm:$0xff]  }
 0x1d6   :  { %3431 = vmatprep.subr.bf16.mxu0 %v5708_v62  ;;  %3759 = vmatprep.subr.bf16.mxu1 %v5711_v63  ;;  %v5798_v62 = vld [vmem:[#allocation5 + $0xd24] ss:$16 sps:$4 sm:$0xff]   ;;  %v5801_v63 = vld [vmem:[#allocation5 + $0xd2c] ss:$16 sps:$4 sm:$0xff]  }
 0x1d9   :  { %3432 = vmatpush1.bf16.msra.mxu0 %v5706_v0  ;;  %3760 = vmatpush1.bf16.msra.mxu1 %v5709_v1  ;;  %v5796_v0 = vld [vmem:[#allocation5 + $0xd20] ss:$16 sps:$4 sm:$0xff]   ;;  %v5799_v1 = vld [vmem:[#allocation5 + $0xd28] ss:$16 sps:$4 sm:$0xff]  }
 0x1da   :  { %3433 = vmatprep.subr.bf16.mxu0 %v5714_v2  ;;  %3761 = vmatprep.subr.bf16.mxu1 %v5717_v3  ;;  %v5804_v2 = vld [vmem:[#allocation5 + $0xd44] ss:$16 sps:$4 sm:$0xff]   ;;  %v5807_v3 = vld [vmem:[#allocation5 + $0xd4c] ss:$16 sps:$4 sm:$0xff]  }
 0x1dd   :  { %3434 = vmatpush1.bf16.msra.mxu0 %v5712_v4  ;;  %3762 = vmatpush1.bf16.msra.mxu1 %v5715_v5  ;;  %v5802_v4 = vld [vmem:[#allocation5 + $0xd40] ss:$16 sps:$4 sm:$0xff]   ;;  %v5805_v5 = vld [vmem:[#allocation5 + $0xd48] ss:$16 sps:$4 sm:$0xff]  }
 0x1de   :  { %3435 = vmatprep.subr.bf16.mxu0 %v5720_v6  ;;  %3763 = vmatprep.subr.bf16.mxu1 %v5723_v7  ;;  %v5810_v6 = vld [vmem:[#allocation5 + $0xd64] ss:$16 sps:$4 sm:$0xff]   ;;  %v5813_v7 = vld [vmem:[#allocation5 + $0xd6c] ss:$16 sps:$4 sm:$0xff]  }
 0x1e1   :  { %3436 = vmatpush1.bf16.msra.mxu0 %v5718_v8  ;;  %3764 = vmatpush1.bf16.msra.mxu1 %v5721_v9  ;;  %v5808_v8 = vld [vmem:[#allocation5 + $0xd60] ss:$16 sps:$4 sm:$0xff]   ;;  %v5811_v9 = vld [vmem:[#allocation5 + $0xd68] ss:$16 sps:$4 sm:$0xff]  }
 0x1e2   :  { %3437 = vmatprep.subr.bf16.mxu0 %v5726_v10  ;;  %3765 = vmatprep.subr.bf16.mxu1 %v5729_v11  ;;  %v5816_v10 = vld [vmem:[#allocation5 + $0xd84] ss:$16 sps:$4 sm:$0xff]   ;;  %v5819_v11 = vld [vmem:[#allocation5 + $0xd8c] ss:$16 sps:$4 sm:$0xff]  }
 0x1e5   :  { %3438 = vmatpush1.bf16.msra.mxu0 %v5724_v12  ;;  %3766 = vmatpush1.bf16.msra.mxu1 %v5727_v13  ;;  %v5814_v12 = vld [vmem:[#allocation5 + $0xd80] ss:$16 sps:$4 sm:$0xff]   ;;  %v5817_v13 = vld [vmem:[#allocation5 + $0xd88] ss:$16 sps:$4 sm:$0xff]  }
 0x1e6   :  { %3439 = vmatprep.subr.bf16.mxu0 %v5732_v14  ;;  %3767 = vmatprep.subr.bf16.mxu1 %v5735_v15  ;;  %v5822_v14 = vld [vmem:[#allocation5 + $0xda4] ss:$16 sps:$4 sm:$0xff]   ;;  %v5825_v15 = vld [vmem:[#allocation5 + $0xdac] ss:$16 sps:$4 sm:$0xff]  }
 0x1e9   :  { %3440 = vmatpush1.bf16.msra.mxu0 %v5730_v16  ;;  %3768 = vmatpush1.bf16.msra.mxu1 %v5733_v17  ;;  %v5820_v16 = vld [vmem:[#allocation5 + $0xda0] ss:$16 sps:$4 sm:$0xff]   ;;  %v5823_v17 = vld [vmem:[#allocation5 + $0xda8] ss:$16 sps:$4 sm:$0xff]  }
 0x1ea   :  { %3441 = vmatprep.subr.bf16.mxu0 %v5738_v18  ;;  %3769 = vmatprep.subr.bf16.mxu1 %v5741_v19  ;;  %v5828_v18 = vld [vmem:[#allocation5 + $0xdc4] ss:$16 sps:$4 sm:$0xff]   ;;  %v5831_v19 = vld [vmem:[#allocation5 + $0xdcc] ss:$16 sps:$4 sm:$0xff]  }
 0x1ed   :  { %3442 = vmatpush1.bf16.msra.mxu0 %v5736_v20  ;;  %3770 = vmatpush1.bf16.msra.mxu1 %v5739_v21  ;;  %v5826_v20 = vld [vmem:[#allocation5 + $0xdc0] ss:$16 sps:$4 sm:$0xff]   ;;  %v5829_v21 = vld [vmem:[#allocation5 + $0xdc8] ss:$16 sps:$4 sm:$0xff]  }
 0x1ee   :  { %3452 = vmatprep.subr.bf16.mxu0 %v5744_v23  ;;  %3780 = vmatprep.subr.bf16.mxu1 %v5747_v24  ;;  %v5834_v23 = vld [vmem:[#allocation5 + $0xde4] ss:$16 sps:$4 sm:$0xff]   ;;  %v5837_v24 = vld [vmem:[#allocation5 + $0xdec] ss:$16 sps:$4 sm:$0xff]  }
 0x1f0   :  { %3444 = vmatmul.mubr.bf16.vlgmr.msra.gmra.mrb[0].mxu0 %v128_v25  ;;  %3772 = vmatmul.mubr.bf16.vlgmr.msra.gmra.mrb[0].mxu1 %v128_v25  ;;  %v5832_v25 = vld [vmem:[#allocation5 + $0xde0] ss:$16 sps:$4 sm:$0xff]  }
 0x1f1   :  { %3453 = vmatpush1.bf16.msra.mxu0 %v5742_v27  ;;  %3781 = vmatpush1.bf16.msra.mxu1 %v5745_v28  ;;  %v5835_v27 = vld [vmem:[#allocation5 + $0xde8] ss:$16 sps:$4 sm:$0xff]   ;;  %v6312_v28 = vld [vmem:[#allocation2 + $0x60] sm:$0xff] }
 0x1f2   :  { %3454 = vmatprep.subr.bf16.mxu0 %v5750_v29  ;;  %3782 = vmatprep.subr.bf16.mxu1 %v5753_v30  ;;  %v5840_v29 = vld [vmem:[#allocation5 + $0xe04] ss:$16 sps:$4 sm:$0xff]   ;;  %v5843_v30 = vld [vmem:[#allocation5 + $0xe0c] ss:$16 sps:$4 sm:$0xff]  }
 0x1f3   :  { %3484 = vmatprep.mubr.bf16.mxu0 %v131_v31  ;;  %3812 = vmatprep.mubr.bf16.mxu1 %v131_v31  ;;  %v130_v31 = vpack.c.bf16 %v6312_v28, %v6312_v28 }
 0x1f5   :  { %3455 = vmatpush1.bf16.msra.mxu0 %v5748_v32  ;;  %3783 = vmatpush1.bf16.msra.mxu1 %v5751_v33  ;;  %v6316_v32 = vld [vmem:[#allocation2 + $0x78] sm:$0xff]  ;;  %v5838_v33 = vld [vmem:[#allocation5 + $0xe00] ss:$16 sps:$4 sm:$0xff]  }
 0x1f6   :  { %3456 = vmatprep.subr.bf16.mxu0 %v5756_v34  ;;  %3784 = vmatprep.subr.bf16.mxu1 %v5759_v35  ;;  %v5841_v34 = vld [vmem:[#allocation5 + $0xe08] ss:$16 sps:$4 sm:$0xff]   ;;  %v5846_v35 = vld [vmem:[#allocation5 + $0xe24] ss:$16 sps:$4 sm:$0xff]  }
 0x1f9   :  { %3457 = vmatpush1.bf16.msra.mxu0 %v5754_v36  ;;  %3785 = vmatpush1.bf16.msra.mxu1 %v5757_v37  ;;  %v5849_v36 = vld [vmem:[#allocation5 + $0xe2c] ss:$16 sps:$4 sm:$0xff]   ;;  %v133_v37 = vpack.c.bf16 %v6316_v32, %v6316_v32 }
 0x1fa   :  { %3458 = vmatprep.subr.bf16.mxu0 %v5762_v38  ;;  %3786 = vmatprep.subr.bf16.mxu1 %v5765_v39  ;;  %v5844_v38 = vld [vmem:[#allocation5 + $0xe20] ss:$16 sps:$4 sm:$0xff]   ;;  %v5847_v39 = vld [vmem:[#allocation5 + $0xe28] ss:$16 sps:$4 sm:$0xff]  }
 0x1fd   :  { %3459 = vmatpush1.bf16.msra.mxu0 %v5760_v40  ;;  %3787 = vmatpush1.bf16.msra.mxu1 %v5763_v41  ;;  %v5852_v40 = vld [vmem:[#allocation5 + $0xe44] ss:$16 sps:$4 sm:$0xff]   ;;  %v5855_v41 = vld [vmem:[#allocation5 + $0xe4c] ss:$16 sps:$4 sm:$0xff]  }
 0x1fe   :  { %3460 = vmatprep.subr.bf16.mxu0 %v5768_v42  ;;  %3788 = vmatprep.subr.bf16.mxu1 %v5771_v43  ;;  %v5850_v42 = vld [vmem:[#allocation5 + $0xe40] ss:$16 sps:$4 sm:$0xff]   ;;  %v5853_v43 = vld [vmem:[#allocation5 + $0xe48] ss:$16 sps:$4 sm:$0xff]  }
 0x201   :  { %3461 = vmatpush1.bf16.msra.mxu0 %v5766_v44  ;;  %3789 = vmatpush1.bf16.msra.mxu1 %v5769_v45  ;;  %v5858_v44 = vld [vmem:[#allocation5 + $0xe64] ss:$16 sps:$4 sm:$0xff]   ;;  %v5861_v45 = vld [vmem:[#allocation5 + $0xe6c] ss:$16 sps:$4 sm:$0xff]  }
 0x202   :  { %3462 = vmatprep.subr.bf16.mxu0 %v5774_v46  ;;  %3790 = vmatprep.subr.bf16.mxu1 %v5777_v47  ;;  %v5856_v46 = vld [vmem:[#allocation5 + $0xe60] ss:$16 sps:$4 sm:$0xff]   ;;  %v5859_v47 = vld [vmem:[#allocation5 + $0xe68] ss:$16 sps:$4 sm:$0xff]  }
 0x205   :  { %3463 = vmatpush1.bf16.msra.mxu0 %v5772_v48  ;;  %3791 = vmatpush1.bf16.msra.mxu1 %v5775_v49  ;;  %v5864_v48 = vld [vmem:[#allocation5 + $0xe84] ss:$16 sps:$4 sm:$0xff]   ;;  %v5867_v49 = vld [vmem:[#allocation5 + $0xe8c] ss:$16 sps:$4 sm:$0xff]  }
 0x206   :  { %3464 = vmatprep.subr.bf16.mxu0 %v5780_v50  ;;  %3792 = vmatprep.subr.bf16.mxu1 %v5783_v51  ;;  %v5862_v50 = vld [vmem:[#allocation5 + $0xe80] ss:$16 sps:$4 sm:$0xff]   ;;  %v5865_v51 = vld [vmem:[#allocation5 + $0xe88] ss:$16 sps:$4 sm:$0xff]  }
 0x209   :  { %3465 = vmatpush1.bf16.msra.mxu0 %v5778_v52  ;;  %3793 = vmatpush1.bf16.msra.mxu1 %v5781_v53  ;;  %v5870_v52 = vld [vmem:[#allocation5 + $0xea4] ss:$16 sps:$4 sm:$0xff]   ;;  %v5873_v53 = vld [vmem:[#allocation5 + $0xeac] ss:$16 sps:$4 sm:$0xff]  }
 0x20a   :  { %3466 = vmatprep.subr.bf16.mxu0 %v5786_v54  ;;  %3794 = vmatprep.subr.bf16.mxu1 %v5789_v55  ;;  %v5868_v54 = vld [vmem:[#allocation5 + $0xea0] ss:$16 sps:$4 sm:$0xff]   ;;  %v5871_v55 = vld [vmem:[#allocation5 + $0xea8] ss:$16 sps:$4 sm:$0xff]  }
 0x20d   :  { %3467 = vmatpush1.bf16.msra.mxu0 %v5784_v56  ;;  %3795 = vmatpush1.bf16.msra.mxu1 %v5787_v57  ;;  %v5876_v56 = vld [vmem:[#allocation5 + $0xec4] ss:$16 sps:$4 sm:$0xff]   ;;  %v5879_v57 = vld [vmem:[#allocation5 + $0xecc] ss:$16 sps:$4 sm:$0xff]  }
 0x20e   :  { %3468 = vmatprep.subr.bf16.mxu0 %v5792_v58  ;;  %3796 = vmatprep.subr.bf16.mxu1 %v5795_v59  ;;  %v5874_v58 = vld [vmem:[#allocation5 + $0xec0] ss:$16 sps:$4 sm:$0xff]   ;;  %v5877_v59 = vld [vmem:[#allocation5 + $0xec8] ss:$16 sps:$4 sm:$0xff]  }
 0x211   :  { %3469 = vmatpush1.bf16.msra.mxu0 %v5790_v60  ;;  %3797 = vmatpush1.bf16.msra.mxu1 %v5793_v61  ;;  %v5882_v60 = vld [vmem:[#allocation5 + $0xee4] ss:$16 sps:$4 sm:$0xff]   ;;  %v5885_v61 = vld [vmem:[#allocation5 + $0xeec] ss:$16 sps:$4 sm:$0xff]  }
 0x212   :  { %3470 = vmatprep.subr.bf16.mxu0 %v5798_v62  ;;  %3798 = vmatprep.subr.bf16.mxu1 %v5801_v63  ;;  %v5880_v62 = vld [vmem:[#allocation5 + $0xee0] ss:$16 sps:$4 sm:$0xff]   ;;  %v5883_v63 = vld [vmem:[#allocation5 + $0xee8] ss:$16 sps:$4 sm:$0xff]  }
 0x215   :  { %3471 = vmatpush1.bf16.msra.mxu0 %v5796_v0  ;;  %3799 = vmatpush1.bf16.msra.mxu1 %v5799_v1  ;;  %v5888_v0 = vld [vmem:[#allocation5 + $0xf04] ss:$16 sps:$4 sm:$0xff]   ;;  %v5891_v1 = vld [vmem:[#allocation5 + $0xf0c] ss:$16 sps:$4 sm:$0xff]  }
 0x216   :  { %3472 = vmatprep.subr.bf16.mxu0 %v5804_v2  ;;  %3800 = vmatprep.subr.bf16.mxu1 %v5807_v3  ;;  %v5886_v2 = vld [vmem:[#allocation5 + $0xf00] ss:$16 sps:$4 sm:$0xff]   ;;  %v5889_v3 = vld [vmem:[#allocation5 + $0xf08] ss:$16 sps:$4 sm:$0xff]  }
 0x219   :  { %3473 = vmatpush1.bf16.msra.mxu0 %v5802_v4  ;;  %3801 = vmatpush1.bf16.msra.mxu1 %v5805_v5  ;;  %v5894_v4 = vld [vmem:[#allocation5 + $0xf24] ss:$16 sps:$4 sm:$0xff]   ;;  %v5897_v5 = vld [vmem:[#allocation5 + $0xf2c] ss:$16 sps:$4 sm:$0xff]  }
 0x21a   :  { %3474 = vmatprep.subr.bf16.mxu0 %v5810_v6  ;;  %3802 = vmatprep.subr.bf16.mxu1 %v5813_v7  ;;  %v5892_v6 = vld [vmem:[#allocation5 + $0xf20] ss:$16 sps:$4 sm:$0xff]   ;;  %v5895_v7 = vld [vmem:[#allocation5 + $0xf28] ss:$16 sps:$4 sm:$0xff]  }
 0x21d   :  { %3475 = vmatpush1.bf16.msra.mxu0 %v5808_v8  ;;  %3803 = vmatpush1.bf16.msra.mxu1 %v5811_v9  ;;  %v5900_v8 = vld [vmem:[#allocation5 + $0xf44] ss:$16 sps:$4 sm:$0xff]   ;;  %v5903_v9 = vld [vmem:[#allocation5 + $0xf4c] ss:$16 sps:$4 sm:$0xff]  }
 0x21e   :  { %3476 = vmatprep.subr.bf16.mxu0 %v5816_v10  ;;  %3804 = vmatprep.subr.bf16.mxu1 %v5819_v11  ;;  %v5898_v10 = vld [vmem:[#allocation5 + $0xf40] ss:$16 sps:$4 sm:$0xff]   ;;  %v5901_v11 = vld [vmem:[#allocation5 + $0xf48] ss:$16 sps:$4 sm:$0xff]  }
 0x221   :  { %3477 = vmatpush1.bf16.msra.mxu0 %v5814_v12  ;;  %3805 = vmatpush1.bf16.msra.mxu1 %v5817_v13  ;;  %v5906_v12 = vld [vmem:[#allocation5 + $0xf64] ss:$16 sps:$4 sm:$0xff]   ;;  %v5909_v13 = vld [vmem:[#allocation5 + $0xf6c] ss:$16 sps:$4 sm:$0xff]  }
 0x222   :  { %3478 = vmatprep.subr.bf16.mxu0 %v5822_v14  ;;  %3806 = vmatprep.subr.bf16.mxu1 %v5825_v15  ;;  %v5904_v14 = vld [vmem:[#allocation5 + $0xf60] ss:$16 sps:$4 sm:$0xff]   ;;  %v5907_v15 = vld [vmem:[#allocation5 + $0xf68] ss:$16 sps:$4 sm:$0xff]  }
 0x225   :  { %3479 = vmatpush1.bf16.msra.mxu0 %v5820_v16  ;;  %3807 = vmatpush1.bf16.msra.mxu1 %v5823_v17  ;;  %v5912_v16 = vld [vmem:[#allocation5 + $0xf84] ss:$16 sps:$4 sm:$0xff]   ;;  %v5915_v17 = vld [vmem:[#allocation5 + $0xf8c] ss:$16 sps:$4 sm:$0xff]  }
 0x226   :  { %3480 = vmatprep.subr.bf16.mxu0 %v5828_v18  ;;  %3808 = vmatprep.subr.bf16.mxu1 %v5831_v19  ;;  %v5910_v18 = vld [vmem:[#allocation5 + $0xf80] ss:$16 sps:$4 sm:$0xff]   ;;  %v5913_v19 = vld [vmem:[#allocation5 + $0xf88] ss:$16 sps:$4 sm:$0xff]  }
 0x229   :  { %3481 = vmatpush1.bf16.msra.mxu0 %v5826_v20  ;;  %3809 = vmatpush1.bf16.msra.mxu1 %v5829_v21  ;;  %v5918_v20 = vld [vmem:[#allocation5 + $0xfa4] ss:$16 sps:$4 sm:$0xff]   ;;  %v5921_v21 = vld [vmem:[#allocation5 + $0xfac] ss:$16 sps:$4 sm:$0xff]  }
 0x22a   :  { %3482 = vmatprep.subr.bf16.mxu0 %v5834_v23  ;;  %3810 = vmatprep.subr.bf16.mxu1 %v5837_v24  ;;  %v5916_v23 = vld [vmem:[#allocation5 + $0xfa0] ss:$16 sps:$4 sm:$0xff]   ;;  %v5919_v24 = vld [vmem:[#allocation5 + $0xfa8] ss:$16 sps:$4 sm:$0xff]  }
 0x22d   :  { %3483 = vmatpush1.bf16.msra.mxu0 %v5832_v25  ;;  %3811 = vmatpush1.bf16.msra.mxu1 %v5835_v27  ;;  %v5924_v25 = vld [vmem:[#allocation5 + $0xfc4] ss:$16 sps:$4 sm:$0xff]   ;;  %v5927_v27 = vld [vmem:[#allocation5 + $0xfcc] ss:$16 sps:$4 sm:$0xff]  }
 0x22e   :  { %3493 = vmatprep.subr.bf16.mxu0 %v5840_v29  ;;  %3821 = vmatprep.subr.bf16.mxu1 %v5843_v30  ;;  %v5922_v29 = vld [vmem:[#allocation5 + $0xfc0] ss:$16 sps:$4 sm:$0xff]   ;;  %v5925_v30 = vld [vmem:[#allocation5 + $0xfc8] ss:$16 sps:$4 sm:$0xff]  }
 0x230   :  { %3485 = vmatmul.mubr.bf16.vlgmr.msra.gmra.mrb[0].mxu0 %v130_v31  ;;  %3813 = vmatmul.mubr.bf16.vlgmr.msra.gmra.mrb[0].mxu1 %v130_v31  ;;  %v5930_v31 = vld [vmem:[#allocation5 + $0xfe4] ss:$16 sps:$4 sm:$0xff]  }
 0x231   :  { %3494 = vmatpush1.bf16.msra.mxu0 %v5838_v33  ;;  %3822 = vmatpush1.bf16.msra.mxu1 %v5841_v34  ;;  %v5933_v33 = vld [vmem:[#allocation5 + $0xfec] ss:$16 sps:$4 sm:$0xff]   ;;  %v5928_v34 = vld [vmem:[#allocation5 + $0xfe0] ss:$16 sps:$4 sm:$0xff]  }
 0x232   :  { %3495 = vmatprep.subr.bf16.mxu0 %v5846_v35  ;;  %3823 = vmatprep.subr.bf16.mxu1 %v5849_v36  ;;  %v5931_v35 = vld [vmem:[#allocation5 + $0xfe8] ss:$16 sps:$4 sm:$0xff]   ;;  %v6320_v36 = vld [vmem:[#allocation2 + $0x70] sm:$0xff] }
 0x233   :  { %3525 = vmatprep.mubr.bf16.mxu0 %v133_v37  ;;  %3853 = vmatprep.mubr.bf16.mxu1 %v133_v37  ;;  %v132_v37 = vpack.c.bf16 %v6320_v36, %v6320_v36 }
 0x235   :  { %3496 = vmatpush1.bf16.msra.mxu0 %v5844_v38  ;;  %3824 = vmatpush1.bf16.msra.mxu1 %v5847_v39  ;;  %v5934_v38 = vld [vmem:[#allocation7 + $0x40] sm:$0xff]  }
 0x236   :  { %3497 = vmatprep.subr.bf16.mxu0 %v5852_v40  ;;  %3825 = vmatprep.subr.bf16.mxu1 %v5855_v41  ;;  %v5935_v39 = vld [vmem:[#allocation7 + $0xc0] sm:$0xff]  }
 0x237   :  { %v5936_v40 = vld [vmem:[#allocation7] sm:$0xff]  }
 0x238   :  { %v5937_v41 = vld [vmem:[#allocation7 + $0x80] sm:$0xff]  }
 0x239   :  { %3498 = vmatpush1.bf16.msra.mxu0 %v5850_v42  ;;  %3826 = vmatpush1.bf16.msra.mxu1 %v5853_v43  ;;  %v5938_v42 = vld [vmem:[#allocation7 + $0x48] sm:$0xff]  }
 0x23a   :  { %3499 = vmatprep.subr.bf16.mxu0 %v5858_v44  ;;  %3827 = vmatprep.subr.bf16.mxu1 %v5861_v45  ;;  %v5939_v43 = vld [vmem:[#allocation7 + $0xc8] sm:$0xff]  }
 0x23b   :  { %v5940_v44 = vld [vmem:[#allocation7 + $0x8] sm:$0xff]  }
 0x23c   :  { %v5941_v45 = vld [vmem:[#allocation7 + $0x88] sm:$0xff]  }
 0x23d   :  { %3500 = vmatpush1.bf16.msra.mxu0 %v5856_v46  ;;  %3828 = vmatpush1.bf16.msra.mxu1 %v5859_v47  ;;  %v5942_v46 = vld [vmem:[#allocation7 + $0x50] sm:$0xff]  }
 0x23e   :  { %3501 = vmatprep.subr.bf16.mxu0 %v5864_v48  ;;  %3829 = vmatprep.subr.bf16.mxu1 %v5867_v49  ;;  %v5943_v47 = vld [vmem:[#allocation7 + $0xd0] sm:$0xff]  }
 0x23f   :  { %v5944_v48 = vld [vmem:[#allocation7 + $0x10] sm:$0xff]  }
 0x240   :  { %v5945_v49 = vld [vmem:[#allocation7 + $0x90] sm:$0xff]  }
 0x241   :  { %3502 = vmatpush1.bf16.msra.mxu0 %v5862_v50  ;;  %3830 = vmatpush1.bf16.msra.mxu1 %v5865_v51  ;;  %v5946_v50 = vld [vmem:[#allocation7 + $0x58] sm:$0xff]  }
 0x242   :  { %3503 = vmatprep.subr.bf16.mxu0 %v5870_v52  ;;  %3831 = vmatprep.subr.bf16.mxu1 %v5873_v53  ;;  %v5947_v51 = vld [vmem:[#allocation7 + $0xd8] sm:$0xff]  }
 0x243   :  { %v5948_v52 = vld [vmem:[#allocation7 + $0x18] sm:$0xff]  }
 0x244   :  { %v5949_v53 = vld [vmem:[#allocation7 + $0x98] sm:$0xff]  }
 0x245   :  { %3504 = vmatpush1.bf16.msra.mxu0 %v5868_v54  ;;  %3832 = vmatpush1.bf16.msra.mxu1 %v5871_v55  ;;  %v5950_v54 = vld [vmem:[#allocation7 + $0x60] sm:$0xff]  }
 0x246   :  { %3505 = vmatprep.subr.bf16.mxu0 %v5876_v56  ;;  %3833 = vmatprep.subr.bf16.mxu1 %v5879_v57  ;;  %v5951_v55 = vld [vmem:[#allocation7 + $0xe0] sm:$0xff]  }
 0x247   :  { %v5952_v56 = vld [vmem:[#allocation7 + $0x20] sm:$0xff]  }
 0x248   :  { %v5953_v57 = vld [vmem:[#allocation7 + $0xa0] sm:$0xff]  }
 0x249   :  { %3506 = vmatpush1.bf16.msra.mxu0 %v5874_v58  ;;  %3834 = vmatpush1.bf16.msra.mxu1 %v5877_v59  ;;  %v5954_v58 = vld [vmem:[#allocation7 + $0x68] sm:$0xff]  }
 0x24a   :  { %3507 = vmatprep.subr.bf16.mxu0 %v5882_v60  ;;  %3835 = vmatprep.subr.bf16.mxu1 %v5885_v61  ;;  %v5955_v59 = vld [vmem:[#allocation7 + $0xe8] sm:$0xff]  }
 0x24b   :  { %v5956_v60 = vld [vmem:[#allocation7 + $0x28] sm:$0xff]  }
 0x24c   :  { %v5957_v61 = vld [vmem:[#allocation7 + $0xa8] sm:$0xff]  }
 0x24d   :  { %3508 = vmatpush1.bf16.msra.mxu0 %v5880_v62  ;;  %3836 = vmatpush1.bf16.msra.mxu1 %v5883_v63  ;;  %v5958_v62 = vld [vmem:[#allocation7 + $0x70] sm:$0xff]  }
 0x24e   :  { %3509 = vmatprep.subr.bf16.mxu0 %v5888_v0  ;;  %3837 = vmatprep.subr.bf16.mxu1 %v5891_v1  ;;  %v5959_v63 = vld [vmem:[#allocation7 + $0xf0] sm:$0xff]  }
 0x24f   :  { %v5960_v0 = vld [vmem:[#allocation7 + $0x30] sm:$0xff]  }
 0x250   :  { %v5961_v1 = vld [vmem:[#allocation7 + $0xb0] sm:$0xff]  }
 0x251   :  { %3510 = vmatpush1.bf16.msra.mxu0 %v5886_v2  ;;  %3838 = vmatpush1.bf16.msra.mxu1 %v5889_v3  ;;  %v5962_v2 = vld [vmem:[#allocation7 + $0x78] sm:$0xff]  }
 0x252   :  { %3511 = vmatprep.subr.bf16.mxu0 %v5894_v4  ;;  %3839 = vmatprep.subr.bf16.mxu1 %v5897_v5  ;;  %v5963_v3 = vld [vmem:[#allocation7 + $0xf8] sm:$0xff]  }
 0x253   :  { %v5964_v4 = vld [vmem:[#allocation7 + $0x38] sm:$0xff]  }
 0x254   :  { %v5965_v5 = vld [vmem:[#allocation7 + $0xb8] sm:$0xff]  }
 0x255   :  { %3512 = vmatpush1.bf16.msra.mxu0 %v5892_v6  ;;  %3840 = vmatpush1.bf16.msra.mxu1 %v5895_v7 }
 0x256   :  { %3513 = vmatprep.subr.bf16.mxu0 %v5900_v8  ;;  %3841 = vmatprep.subr.bf16.mxu1 %v5903_v9 }
 0x259   :  { %3514 = vmatpush1.bf16.msra.mxu0 %v5898_v10  ;;  %3842 = vmatpush1.bf16.msra.mxu1 %v5901_v11 }
 0x25a   :  { %3515 = vmatprep.subr.bf16.mxu0 %v5906_v12  ;;  %3843 = vmatprep.subr.bf16.mxu1 %v5909_v13 }
 0x25d   :  { %3516 = vmatpush1.bf16.msra.mxu0 %v5904_v14  ;;  %3844 = vmatpush1.bf16.msra.mxu1 %v5907_v15 }
 0x25e   :  { %3517 = vmatprep.subr.bf16.mxu0 %v5912_v16  ;;  %3845 = vmatprep.subr.bf16.mxu1 %v5915_v17 }
 0x261   :  { %3518 = vmatpush1.bf16.msra.mxu0 %v5910_v18  ;;  %3846 = vmatpush1.bf16.msra.mxu1 %v5913_v19 }
 0x262   :  { %3519 = vmatprep.subr.bf16.mxu0 %v5918_v20  ;;  %3847 = vmatprep.subr.bf16.mxu1 %v5921_v21 }
 0x265   :  { %3520 = vmatpush1.bf16.msra.mxu0 %v5916_v23  ;;  %3848 = vmatpush1.bf16.msra.mxu1 %v5919_v24 }
 0x266   :  { %3521 = vmatprep.subr.bf16.mxu0 %v5924_v25  ;;  %3849 = vmatprep.subr.bf16.mxu1 %v5927_v27 }
 0x269   :  { %3522 = vmatpush1.bf16.msra.mxu0 %v5922_v29  ;;  %3850 = vmatpush1.bf16.msra.mxu1 %v5925_v30 }
 0x26a   :  { %3523 = vmatprep.subr.bf16.mxu0 %v5930_v31  ;;  %3851 = vmatprep.subr.bf16.mxu1 %v5933_v33 }
 0x26d   :  { %3524 = vmatpush1.bf16.msra.mxu0 %v5928_v34  ;;  %3852 = vmatpush1.bf16.msra.mxu1 %v5931_v35 }
 0x26e   :  { %5053 = vmatprep.subr.bf16.mxu0 %v5934_v38  ;;  %5075 = vmatprep.subr.bf16.mxu1 %v5935_v39 }
 0x270   :  { %3526 = vmatmul.mubr.bf16.vlgmr.msra.gmra.mrb[0].mxu0 %v132_v37  ;;  %3854 = vmatmul.mubr.bf16.vlgmr.msra.gmra.mrb[0].mxu1 %v132_v37 }
 0x271   :  { %5054 = vmatpush3.bf16.msra.mxu0 %v5936_v40  ;;  %5076 = vmatpush3.bf16.msra.mxu1 %v5937_v41 }
 0x272   :  { %5055 = vmatprep.subr.bf16.mxu0 %v5938_v42  ;;  %5077 = vmatprep.subr.bf16.mxu1 %v5939_v43 }
 0x275   :  { %5056 = vmatpush3.bf16.msra.mxu0 %v5940_v44  ;;  %5078 = vmatpush3.bf16.msra.mxu1 %v5941_v45 }
 0x276   :  { %5057 = vmatprep.subr.bf16.mxu0 %v5942_v46  ;;  %5079 = vmatprep.subr.bf16.mxu1 %v5943_v47 }
 0x279   :  { %5058 = vmatpush3.bf16.msra.mxu0 %v5944_v48  ;;  %5080 = vmatpush3.bf16.msra.mxu1 %v5945_v49 }
 0x27a   :  { %5059 = vmatprep.subr.bf16.mxu0 %v5946_v50  ;;  %5081 = vmatprep.subr.bf16.mxu1 %v5947_v51 }
 0x27d   :  { %5060 = vmatpush3.bf16.msra.mxu0 %v5948_v52  ;;  %5082 = vmatpush3.bf16.msra.mxu1 %v5949_v53 }
 0x27e   :  { %5061 = vmatprep.subr.bf16.mxu0 %v5950_v54  ;;  %5083 = vmatprep.subr.bf16.mxu1 %v5951_v55 }
 0x281   :  { %5062 = vmatpush3.bf16.msra.mxu0 %v5952_v56  ;;  %5084 = vmatpush3.bf16.msra.mxu1 %v5953_v57 }
 0x282   :  { %5063 = vmatprep.subr.bf16.mxu0 %v5954_v58  ;;  %5085 = vmatprep.subr.bf16.mxu1 %v5955_v59 }
 0x285   :  { %5064 = vmatpush3.bf16.msra.mxu0 %v5956_v60  ;;  %5086 = vmatpush3.bf16.msra.mxu1 %v5957_v61 }
 0x286   :  { %5065 = vmatprep.subr.bf16.mxu0 %v5958_v62  ;;  %5087 = vmatprep.subr.bf16.mxu1 %v5959_v63 }
 0x289   :  { %5066 = vmatpush3.bf16.msra.mxu0 %v5960_v0  ;;  %5088 = vmatpush3.bf16.msra.mxu1 %v5961_v1 }
 0x28a   :  { %5067 = vmatprep.subr.bf16.mxu0 %v5962_v2  ;;  %5089 = vmatprep.subr.bf16.mxu1 %v5963_v3 }
 0x28d   :  { %5068 = vmatpush3.bf16.msra.mxu0 %v5964_v4  ;;  %5090 = vmatpush3.bf16.msra.mxu1 %v5965_v5 }
 0x343   :  { %v6324_v6 = vpop.f32.mrb[0].mxu0  ;;  %v6326_v7 = vpop.f32.mrb[0].mxu1 }
 0x344   :  { %v3929_v8 = vrot.slane %v6324_v6, 4  ;;  %v3941_v9 = vrot.slane %v6326_v7, 4  ;;  %v6330_v10 = vpop.f32.mrb[1].mxu0  ;;  %v6332_v11 = vpop.f32.mrb[1].mxu1 }
 0x345   :  { %v3935_v12 = vrot.slane %v6330_v10, 4  ;;  %v3947_v13 = vrot.slane %v6332_v11, 4  ;;  %v3531_v14 = vpop.f32.mrb[2].mxu0  ;;  %v3859_v15 = vpop.f32.mrb[2].mxu1 }
 0x346   :  { %v3930_v16 = vadd.f32 %v3929_v8, %v6324_v6  ;;  %v3942_v17 = vadd.f32 %v3941_v9, %v6326_v7  ;;  %v3532_v18 = vpop.f32.mrb[3].mxu0  ;;  %v3860_v19 = vpop.f32.mrb[3].mxu1 }
 0x347   :  { %v3936_v20 = vadd.f32 %v3935_v12, %v6330_v10  ;;  %v3948_v21 = vadd.f32 %v3947_v13, %v6332_v11 }
 0x348   :  { %v3931_v23 = vrot.slane %v3930_v16, 2  ;;  %v3943_v24 = vrot.slane %v3942_v17, 2 }
 0x349   :  { %v3937_v25 = vrot.slane %v3936_v20, 2  ;;  %v3949_v27 = vrot.slane %v3948_v21, 2 }
 0x34a   :  { %v3932_v29 = vadd.f32 %v3931_v23, %v3930_v16  ;;  %v3944_v30 = vadd.f32 %v3943_v24, %v3942_v17 }
 0x34b   :  { %v3938_v31 = vadd.f32 %v3937_v25, %v3936_v20  ;;  %v3950_v33 = vadd.f32 %v3949_v27, %v3948_v21 }
 0x34c   :  { %v3933_v34 = vrot.slane %v3932_v29, 1  ;;  %v3945_v35 = vrot.slane %v3944_v30, 1 }
 0x34d   :  { %v3939_v37 = vrot.slane %v3938_v31, 1  ;;  %v3951_v38 = vrot.slane %v3950_v33, 1 }
 0x34e   :  { %v3934_v39 = vadd.f32 %v3933_v34, %v3932_v29  ;;  %v3946_v40 = vadd.f32 %v3945_v35, %v3944_v30  ;;  %v6189_v30 = vmov 1966171168  }
 0x34f   :  { %v3940_v41 = vadd.f32 %v3939_v37, %v3938_v31  ;;  %v3952_v42 = vadd.f32 %v3951_v38, %v3950_v33  ;;  %v4009_v31 = vunpack.c.l.s4 %v6189_v30  ;;  %v4011_v33 = vlaneseq }
 0x350   :  { %v6340_v43 = vmul.f32 0.125, %v3934_v39  ;;  %v6342_v44 = vmul.f32 0.125, %v3946_v40 }
 0x351   :  { %v6344_v45 = vmul.f32 0.125, %v3940_v41  ;;  %v6346_v46 = vmul.f32 0.125, %v3952_v42  ;;  %v4010_v34 = vunpack.c.0.s8 %v4009_v31  ;;  %v4012_v35 = vshrl.u32 %v4011_v33, 7  ;;  %v6368_v31 = vld [vmem:[#allocation2] sm:$0xff] }
 0x352   :  { %v3958_v47 = vsub.f32 %v6324_v6, %v6340_v43  ;;  %v3960_v48 = vsub.f32 %v6326_v7, %v6342_v44  ;;  %v4409_v33 = vmul.f32 %v6368_v31, %v6368_v31 }
 0x353   :  { %v3959_v49 = vsub.f32 %v6330_v10, %v6344_v45  ;;  %v3961_v50 = vsub.f32 %v6332_v11, %v6346_v46  ;;  %v4013_v39 = vsub.s32 %v4010_v34, %v4012_v35 }
 0x354   :  { %v3962_v51 = vmul.f32 %v3958_v47, %v3958_v47  ;;  %v3964_v52 = vmul.f32 %v3960_v48, %v3960_v48 }
 0x355   :  { %v3963_v53 = vmul.f32 %v3959_v49, %v3959_v49  ;;  %v3965_v54 = vmul.f32 %v3961_v50, %v3961_v50 }
 0x356   :  { %v3966_v55 = vrot.slane %v3962_v51, 4  ;;  %v3978_v56 = vrot.slane %v3964_v52, 4 }
 0x357   :  { %v3972_v57 = vrot.slane %v3963_v53, 4  ;;  %v3984_v58 = vrot.slane %v3965_v54, 4 }
 0x358   :  { %v3967_v59 = vadd.f32 %v3966_v55, %v3962_v51  ;;  %v3979_v60 = vadd.f32 %v3978_v56, %v3964_v52  ;;  %v3927_v51 = vld [vmem:[#allocation10] sm:$0xf]  ;;  %v4043_v52 = vsub.s32 2, %v4012_v35  ;;  %v4035_v55 = vsub.s32 0, %v4012_v35 }
 0x359   :  { %v3973_v61 = vadd.f32 %v3972_v57, %v3963_v53  ;;  %v3985_v62 = vadd.f32 %v3984_v58, %v3965_v54  ;;  %v4047_v54 = vsub.s32 3, %v4012_v35  ;;  %v4039_v56 = vsub.s32 1, %v4012_v35  ;;  %v6372_v35 = vld [vmem:[#allocation2 + $0x10] sm:$0xff] }
 0x35a   :  { %v3968_v63 = vrot.slane %v3967_v59, 2  ;;  %v3980_v0 = vrot.slane %v3979_v60, 2 }
 0x35b   :  { %v3974_v1 = vrot.slane %v3973_v61, 2  ;;  %v3986_v2 = vrot.slane %v3985_v62, 2 }
 0x35c   :  { %v3969_v3 = vadd.f32 %v3968_v63, %v3967_v59  ;;  %v3981_v4 = vadd.f32 %v3980_v0, %v3979_v60 }
 0x35d   :  { %v3975_v5 = vadd.f32 %v3974_v1, %v3973_v61  ;;  %v3987_v8 = vadd.f32 %v3986_v2, %v3985_v62 }
 0x35e   :  { %v3970_v9 = vrot.slane %v3969_v3, 1  ;;  %v3982_v12 = vrot.slane %v3981_v4, 1 }
 0x35f   :  { %v3976_v13 = vrot.slane %v3975_v5, 1  ;;  %v3988_v14 = vrot.slane %v3987_v8, 1 }
 0x360   :  { %v3971_v15 = vadd.f32 %v3970_v9, %v3969_v3  ;;  %v3983_v16 = vadd.f32 %v3982_v12, %v3981_v4 }
 0x361   :  { %v3977_v17 = vadd.f32 %v3976_v13, %v3975_v5  ;;  %v3989_v18 = vadd.f32 %v3988_v14, %v3987_v8 }
 0x362   :  { %v3990_v19 = vmul.f32 0.125, %v3971_v15  ;;  %v3992_v20 = vmul.f32 0.125, %v3983_v16 }
 0x363   :  { %v3991_v21 = vmul.f32 0.125, %v3977_v17  ;;  %v3993_v23 = vmul.f32 0.125, %v3989_v18 }
 0x364   :  { %v3994_v24 = vadd.f32 1e-05, %v3990_v19  ;;  %v3996_v25 = vadd.f32 1e-05, %v3992_v20 }
 0x365   :  { %v3995_v27 = vadd.f32 1e-05, %v3991_v21  ;;  %v3997_v29 = vadd.f32 1e-05, %v3993_v23 }
 0x366   :  { %5966 = vrsqrt.f32 %v3994_v24 }
 0x367   :  { %5968 = vrsqrt.f32 %v3996_v25 }
 0x368   :  { %5970 = vrsqrt.f32 %v3995_v27 }
 0x369   :  { %5972 = vrsqrt.f32 %v3997_v29  ;;  %v6364_v29 = vld [vmem:[#allocation2 + $0x8] sm:$0xff] }
 0x36a   :  { %v4410_v30 = vmul.f32 %v6364_v29, %v6364_v29 }
 0x36c   :  { %v4425_v34 = vadd.f32 %v4410_v30, %v4409_v33 }
 0x370   :  { %v5967_v37 = vpop.eup %5966 }
 0x371   :  { %v5969_v38 = vpop.eup %5968 }
 0x372   :  { %v5971_v40 = vpop.eup %5970 }
 0x373   :  { %v5973_v41 = vpop.eup %5972  ;;  %v4006_v42 = vcombine.low %v5967_v37, %v5971_v40  ;;  %v4411_v37 = vmul.f32 %v6372_v35, %v6372_v35 }
 0x374   :  { %v4007_v47 = vcombine.low %v5969_v38, %v5973_v41  ;;  %v6376_v38 = vld [vmem:[#allocation2 + $0x18] sm:$0xff] }
 0x375   :  { %v4014_v48 = vrot.slane %v4006_v42, %v4013_v39  ;;  %v4426_v40 = vadd.f32 %v4425_v34, %v4411_v37  ;;  %v6380_v42 = vld [vmem:[#allocation2 + $0x20] sm:$0xff] }
 0x376   :  { %v4021_v49 = vrot.slane %v4007_v47, %v4013_v39  ;;  %v4413_v47 = vmul.f32 %v6380_v42, %v6380_v42 }
 0x378   :  { %v4022_v50 = vcombine.low %v4014_v48, %v4021_v49  ;;  %v6384_v48 = vld [vmem:[#allocation2 + $0x28] sm:$0xff] }
 0x379   :  { %v4414_v49 = vmul.f32 %v6384_v48, %v6384_v48 }
 0x37a   :  { %v4029_v53 = vrot.slane %v4022_v50, %v4013_v39 }
 0x37c   :  { %v4031_v57 = vmul.f32 %v4029_v53, %v3927_v51 }
 0x37e   :  { %v4044_v58 = vrot.slane %v4031_v57, %v4043_v52  ;;  %v4048_v59 = vrot.slane %v4031_v57, %v4047_v54  ;;  %v4036_v60 = vrot.slane %v4031_v57, %v4035_v55  ;;  %v4040_v61 = vrot.slane %v4031_v57, %v4039_v56 }
 0x380   :  { %v4055_v62 = vmul.f32 %v4044_v58, %v6342_v44  ;;  %v4056_v63 = vmul.f32 %v4048_v59, %v6346_v46  ;;  %v4090_v0 = vmul.f32 %v4048_v59, %v6332_v11  ;;  %v4053_v1 = vmul.f32 %v4036_v60, %v6340_v43  ;;  %v3928_v44 = vld [vmem:[#allocation11] sm:$0xf] }
 0x381   :  { %v4054_v2 = vmul.f32 %v4040_v61, %v6344_v45  ;;  %v4088_v3 = vmul.f32 %v4040_v61, %v6330_v10  ;;  %v4087_v4 = vmul.f32 %v4036_v60, %v6324_v6  ;;  %v4089_v5 = vmul.f32 %v4044_v58, %v6326_v7  ;;  %v6396_v58 = vld [vmem:[#allocation2 + $0x40] sm:$0xff]  ;;  %v6400_v60 = vld [vmem:[#allocation2 + $0x48] sm:$0xff] }
 0x382   :  { %v4062_v8 = vcombine.low %v4055_v62, %v4056_v63  ;;  %v4417_v59 = vmul.f32 %v6396_v58, %v6396_v58  ;;  %v4418_v61 = vmul.f32 %v6400_v60, %v6400_v60  ;;  %v4419_v63 = vmul.f32 %v6304_v22, %v6304_v22 }
 0x383   :  { %v4061_v9 = vcombine.low %v4053_v1, %v4054_v2  ;;  %v6406_v1 = vld [vmem:[#allocation2 + $0x58] sm:$0xff] }
 0x384   :  { %v4076_v12 = vrot.slane %v4062_v8, %v4013_v39  ;;  %v4420_v2 = vmul.f32 %v6406_v1, %v6406_v1  ;;  %v4422_v8 = vmul.f32 %v6308_v26, %v6308_v26  ;;  %v4424_v26 = vmul.f32 %v6316_v32, %v6316_v32 }
 0x385   :  { %v4069_v13 = vrot.slane %v4061_v9, %v4013_v39 }
 0x387   :  { %v4077_v14 = vcombine.low %v4069_v13, %v4076_v12 }
 0x389   :  { %v4084_v15 = vrot.slane %v4077_v14, %v4013_v39  ;;  %v4412_v39 = vmul.f32 %v6376_v38, %v6376_v38  ;;  %v5020_v14 = vld [vmem:[#allocation8] ss:$0 sm:$0xff] }
 0x38b   :  { %v4086_v46 = vsub.f32 %v3928_v44, %v4084_v15  ;;  %v4427_v41 = vadd.f32 %v4426_v40, %v4412_v39 }
 0x38d   :  { %v4099_v16 = vrot.slane %v4086_v46, %v4039_v56  ;;  %v4107_v11 = vrot.slane %v4086_v46, %v4047_v54  ;;  %v4095_v17 = vrot.slane %v4086_v46, %v4035_v55  ;;  %v4103_v43 = vrot.slane %v4086_v46, %v4043_v52  ;;  %v6388_v52 = vld [vmem:[#allocation2 + $0x30] sm:$0xff]  ;;  %v6392_v54 = vld [vmem:[#allocation2 + $0x38] sm:$0xff] }
 0x38e   :  { %v4428_v50 = vadd.f32 %v4427_v41, %v4413_v47  ;;  %v4415_v53 = vmul.f32 %v6388_v52, %v6388_v52  ;;  %v4416_v55 = vmul.f32 %v6392_v54, %v6392_v54 }
 0x38f   :  { %v4113_v18 = vadd.f32 %v4099_v16, %v4088_v3  ;;  %v4115_v45 = vadd.f32 %v4107_v11, %v4090_v0  ;;  %v4112_v19 = vadd.f32 %v4095_v17, %v4087_v4  ;;  %v4114_v10 = vadd.f32 %v4103_v43, %v4089_v5 }
 0x390   :  { %v4429_v51 = vadd.f32 %v4428_v50, %v4414_v49  ;;  %v4421_v4 = vmul.f32 %v6312_v28, %v6312_v28  ;;  %v4423_v17 = vmul.f32 %v6320_v36, %v6320_v36 }
 0x391   :  { %v4117_v20 = vmax.f32 %v4113_v18, 0.0  ;;  %v4119_v6 = vmax.f32 %v4115_v45, 0.0  ;;  %v4116_v21 = vmax.f32 %v4112_v19, 0.0  ;;  %v4118_v7 = vmax.f32 %v4114_v10, 0.0 }
 0x392   :  { %v4430_v56 = vadd.f32 %v4429_v51, %v4415_v53 }
 0x393   :  { %v4121_v23 = vpack.c.bf16 %v4117_v20, %v4117_v20  ;;  %v4123_v24 = vpack.c.bf16 %v4119_v6, %v4119_v6  ;;  %v4120_v25 = vpack.c.bf16 %v4116_v21, %v4116_v21  ;;  %v4122_v27 = vpack.c.bf16 %v4118_v7, %v4118_v7 }
 0x394   :  { %v4431_v57 = vadd.f32 %v4430_v56, %v4416_v55 }
 0x395   :  { %4354 = vmatprep.mubr.bf16.mxu0 %v4121_v23  ;;  %4394 = vmatprep.mubr.bf16.mxu1 %v4123_v24 }
 0x396   :  { %4355 = vmatmul.mubr.bf16.vlgmr.msra.gmra.mrb[4].mxu0 %v4120_v25  ;;  %4395 = vmatmul.mubr.bf16.vlgmr.msra.gmra.mrb[4].mxu1 %v4122_v27  ;;  %v4432_v62 = vadd.f32 %v4431_v57, %v4417_v59 }
 0x398   :  { %v4433_v0 = vadd.f32 %v4432_v62, %v4418_v61 }
 0x39a   :  { %v4434_v3 = vadd.f32 %v4433_v0, %v4419_v63 }
 0x39c   :  { %v4435_v5 = vadd.f32 %v4434_v3, %v4420_v2 }
 0x39e   :  { %v4436_v9 = vadd.f32 %v4435_v5, %v4421_v4 }
 0x3a0   :  { %v4437_v43 = vadd.f32 %v4436_v9, %v4422_v8 }
 0x3a2   :  { %v4438_v20 = vadd.f32 %v4437_v43, %v4423_v17 }
 0x3a4   :  { %v4439_v21 = vadd.f32 %v4438_v20, %v4424_v26 }
 0x469   :  { %v5069_v12 = vpop.f32.mrb[4].mxu0  ;;  %v5091_v13 = vpop.f32.mrb[4].mxu1 }
 0x46a   :  { %v5070_v44 = vpop.f32.mrb[5].mxu0  ;;  %v5092_v22 = vpop.f32.mrb[5].mxu1 }
 0x46b   :  { %v5071_v15 = vadd.f32 %v5070_v44, %v5069_v12  ;;  %v5093_v46 = vadd.f32 %v5092_v22, %v5091_v13  ;;  %v5072_v16 = vpop.f32.mrb[6].mxu0  ;;  %v5094_v11 = vpop.f32.mrb[6].mxu1 }
 0x46c   :  { %v5073_v18 = vpop.f32.mrb[7].mxu0  ;;  %v5095_v45 = vpop.f32.mrb[7].mxu1 }
 0x46d   :  { %v4357_v19 = vadd.f32 %v5071_v15, %v5020_v14 }
 0x46f   :  { %v4397_v10 = vadd.f32 %v5093_v46, %v4357_v19 }
 0x471   :  { %v4402_v6 = vmul.f32 %v4397_v10, %v4397_v10 }
 0x473   :  { %4403 = vadd.xlane.f32.xlu0 %v4402_v6 }
 0x477   :  { %4440 = vadd.xlane.f32.xlu0 %v4439_v21 }
 0x500   :  { %v4404_v7 = vpop.xlane.xlu0 %4403 }
 0x501   :  { %v4405_v23 = vmax.f32 %v4404_v7, 1e-24 }
 0x503   :  { %5974 = vrsqrt.f32 %v4405_v23 }
 0x504   :  { %v4441_v24 = vpop.xlane.xlu0 %4440 }
 0x505   :  { %v4442_v25 = vmax.f32 %v4441_v24, 1e-24 }
 0x507   :  { %5976 = vrsqrt.f32 %v4442_v25 }
 0x50d   :  { %v5975_v27 = vpop.eup %5974 }
 0x50e   :  { %v4407_v30 = vmul.f32 %v5975_v27, %v4397_v10 }
 0x510   :  { %4408 = vst [vmem:[#allocation14] sm:$0xff] %v4407_v30 }
 0x511   :  { %v5977_v33 = vpop.eup %5976 }
 0x512   :  { %6134 = shalt.err (!%p6131_p10)
}
 0x513   :  { %s6135_s27 = scalar_lea.hbm %s6463_s7, 128 }
 0x514   :  { %p6136_p11 = scmp.ne.s32.totalorder %s6463_s7, %s6135_s27  ;;  %p6139_p12 = scmp.lt.u32.totalorder %s6135_s27, %s6463_s7 }
 0x516   :  { %p6141_p13 = pnand %p6139_p12, %p6136_p11 }
 0x518   :  { %6144 = shalt.err (!%p6141_p13)
}
 0x519   :  { %4495 = dma.vmem_to_hbm [thread:$0]  %s4493_s0, 128, %s6463_s7, [#allocation15]   ;;  %v4444_v34 = vmul.f32 %v6368_v31, %v5977_v33  ;;  %v4445_v37 = vmul.f32 %v6364_v29, %v5977_v33  ;;  %v4446_v39 = vmul.f32 %v6372_v35, %v5977_v33  ;;  %v4447_v40 = vmul.f32 %v6376_v38, %v5977_v33  ;;  %v5989_v53 = vld [vmem:[#allocation2 + $0x50] sm:$0xff] }
 0x51a   :  { %s6191_s11 = smov [#allocation13]   ;;  %v4448_v41 = vmul.f32 %v6380_v42, %v5977_v33  ;;  %v4449_v47 = vmul.f32 %v6384_v48, %v5977_v33  ;;  %v4450_v49 = vmul.f32 %v6388_v52, %v5977_v33  ;;  %v4451_v50 = vmul.f32 %v6392_v54, %v5977_v33  ;;  %v5990_v42 = vld [vmem:[#allocation2 + $0x68] sm:$0xff] }
 0x51b   :  { %s4482_s12 = sshll.u32 %s6191_s11, 4  ;;  %v4452_v51 = vmul.f32 %v6396_v58, %v5977_v33  ;;  %v4453_v31 = vmul.f32 %v6400_v60, %v5977_v33  ;;  %v4454_v29 = vmul.f32 %v5989_v53, %v5977_v33  ;;  %v4455_v35 = vmul.f32 %v6406_v1, %v5977_v33  ;;  %4460 = vst [vmem:[#allocation13] sm:$0xff] %v4444_v34  ;;  %s4483_s12 = int_to_ptr.vmem [resolvable:$true] %s4482_s12 }
 0x51c   :  { %4461 = vst [vmem:[#allocation13 + $0x8] sm:$0xff] %v4445_v37  ;;  %4462 = vst [vmem:[#allocation13 + $0x10] sm:$0xff] %v4446_v39  ;;  %v4456_v38 = vmul.f32 %v5977_v33, %v6312_v28  ;;  %v4457_v48 = vmul.f32 %v5990_v42, %v5977_v33  ;;  %v4458_v52 = vmul.f32 %v5977_v33, %v6320_v36  ;;  %s6145_s7 = scalar_lea.vmem %s4483_s12, 2048  ;;  %p6150_p1 = scmp.lt.s32.totalorder %s4483_s12, %s4483_s12 }
 0x51d   :  { %4463 = vst [vmem:[#allocation13 + $0x18] sm:$0xff] %v4447_v40  ;;  %v4459_v54 = vmul.f32 %v5977_v33, %v6316_v32  ;;  %4464 = vst [vmem:[#allocation13 + $0x20] sm:$0xff] %v4448_v41  ;;  %p6146_p0 = scmp.ne.s32.totalorder %s4483_s12, %s6145_s7  ;;  %p6151_p2 = scmp.lt.s32.totalorder %s6145_s7, %s6145_s7 }
 0x51e   :  { %4465 = vst [vmem:[#allocation13 + $0x28] sm:$0xff] %v4449_v47  ;;  %4466 = vst [vmem:[#allocation13 + $0x30] sm:$0xff] %v4450_v49 }
 0x51f   :  { %4467 = vst [vmem:[#allocation13 + $0x38] sm:$0xff] %v4451_v50  ;;  %4468 = vst [vmem:[#allocation13 + $0x40] sm:$0xff] %v4452_v51  ;;  %p6152_p3 = por %p6151_p2, %p6150_p1 }
 0x520   :  { %4469 = vst [vmem:[#allocation13 + $0x48] sm:$0xff] %v4453_v31  ;;  %4470 = vst [vmem:[#allocation13 + $0x50] sm:$0xff] %v4454_v29 }
 0x521   :  { %4471 = vst [vmem:[#allocation13 + $0x58] sm:$0xff] %v4455_v35  ;;  %4472 = vst [vmem:[#allocation13 + $0x60] sm:$0xff] %v4456_v38  ;;  %p6153_p4 = pnand %p6152_p3, %p6146_p0 }
 0x522   :  { %4473 = vst [vmem:[#allocation13 + $0x68] sm:$0xff] %v4457_v48  ;;  %4474 = vst [vmem:[#allocation13 + $0x70] sm:$0xff] %v4458_v52 }
 0x523   :  { %4475 = vst [vmem:[#allocation13 + $0x78] sm:$0xff] %v4459_v54 }
 0x524   :  { %6156 = shalt.err (!%p6153_p4)
}
 0x525   :  { %s6157_s2 = scalar_lea.hbm %s6462_s6, 2048 }
 0x526   :  { %p6158_p5 = scmp.ne.s32.totalorder %s6462_s6, %s6157_s2  ;;  %p6161_p6 = scmp.lt.u32.totalorder %s6157_s2, %s6462_s6 }
 0x528   :  { %p6163_p7 = pnand %p6161_p6, %p6158_p5 }
 0x52a   :  { %6166 = shalt.err (!%p6163_p7)
}
 0x52b   :  { %4485 = dma.vmem_to_hbm [thread:$0]  %s4483_s12, 2048, %s6462_s6, [#allocation4]  }
 0x52c   :  { %6175 = dma.done.wait [#allocation4], 2048  }
 0x52d   :  { %6176 = vsyncadd [#allocation4], 4294965248 }
 0x52e   :  { %6177 = dma.done.wait [#allocation15], 128  }
 0x52f   :  { %6178 = vsyncadd [#allocation15], 4294967168 }
 0x530   :  { %4502 = vsyncpa [#allocation3], 1 }
 0x531   :  { %4503 = vsyncpa [#allocation6], 1 }
 0x532   :  { %4504 = vsyncpa [#allocation9], 1 }
 0x533   :  { %4505 = vsyncpa [#allocation12], 1 }
 0x534   :  { %4506 = vsyncpa [#allocation4], 1 }
 0x535   :  { %4507 = vsyncpa [#allocation15], 1 }

</bundles_post_ra>
